<compile_context>
chip_gen: v6e
topology: v6e:2x2x1
jax: 0.10.0
libtpu: 0.0.40
codegen_flags: <defaults>
</compile_context>

<pallas_src>
import functools

import jax
import jax.numpy as jnp
from jax import lax
from jax.experimental import pallas as pl
from jax.experimental.pallas import tpu as pltpu


def _round_up(x, m):
    return (x + m - 1) // m * m


def _prob_sparse_attn_kernel(q_ref, k_ref, v_ref, o_ref, *, top_k, seq_len):
    # Block shapes: q/o -> (Bb, Lq_p, D_p), k/v -> (Bb, Lk_p, D_p), all f32.
    q = q_ref[...]
    k = k_ref[...]
    v = v_ref[...]

    # scores = Q @ K^T as a batched dot_general (contract last dims) -- no transpose.
    scores = jnp.einsum("bqd,bkd->bqk", q, k, preferred_element_type=jnp.float32)

    neg_inf = jnp.float32(-jnp.inf)
    lk_p = scores.shape[-1]
    if lk_p != seq_len:
        # Mask padded key columns out of the top-k search.
        col = lax.broadcasted_iota(jnp.int32, scores.shape, 2)
        valid = col < seq_len
        scores = jnp.where(valid, scores, neg_inf)
    else:
        valid = None

    # Running per-row k-th-largest threshold: one masked max-reduce per round,
    # carry is only (Bb, Lq_p, 1).
    def _round(_, thresh):
        below = jnp.where(scores < thresh, scores, neg_inf)
        return jnp.max(below, axis=-1, keepdims=True)

    init = jnp.full(scores.shape[:-1] + (1,), jnp.inf, dtype=jnp.float32)
    thresh = lax.fori_loop(0, top_k, _round, init, unroll=True)

    keep = scores >= thresh
    if valid is not None:
        keep = jnp.logical_and(keep, valid)   # never keep padded key columns
    sparse = jnp.where(keep, scores, jnp.float32(0.0))

    # F.normalize default: p=2, dim=1 (query axis), eps=1e-12.
    # Padded query rows are all-zero, so they do not perturb the column norms.
    norm = jnp.sqrt(jnp.sum(sparse * sparse, axis=1, keepdims=True))
    weights = sparse / jnp.maximum(norm, jnp.float32(1e-12))

    out = jnp.einsum("bqk,bkd->bqd", weights, v, preferred_element_type=jnp.float32)
    o_ref[...] = out.astype(o_ref.dtype)


def prob_sparse_attention(query, key, value, *, top_k, block_b=4):
    """query/key/value: (B, L, D) float32 -> (B, L, D)."""
    B, L, D = query.shape
    assert key.shape == (B, L, D) and value.shape == (B, L, D)
    assert 0 < top_k <= L

    Bb = max(1, min(block_b, B))
    B_p = _round_up(B, Bb)
    Lq_p = _round_up(L, 8)      # query rows -> sublane aligned
    Lk_p = _round_up(L, 128)    # key axis of the score tile -> lane aligned
    D_p = _round_up(D, 128)     # lane-dense feature dim / output stores

    def _pad(x, b, l, d):
        return jnp.pad(x, ((0, b - x.shape[0]), (0, l - x.shape[1]), (0, d - x.shape[2])))

    q_p = _pad(query, B_p, Lq_p, D_p)
    k_p = _pad(key, B_p, Lk_p, D_p)
    v_p = _pad(value, B_p, Lk_p, D_p)

    # Conservative VMEM budget: double-buffered IO blocks + score-sized temporaries.
    itemsize = 4
    io_bytes = Bb * (2 * Lq_p + 2 * Lk_p) * D_p * itemsize
    score_bytes = Bb * Lq_p * Lk_p * itemsize
    vmem_limit = int(min(max(2 * io_bytes + 6 * score_bytes + (4 << 20), 16 << 20), 64 << 20))

    kernel = functools.partial(_prob_sparse_attn_kernel, top_k=top_k, seq_len=L)

    out_p = pl.pallas_call(
        kernel,
        out_shape=jax.ShapeDtypeStruct((B_p, Lq_p, D_p), query.dtype),
        grid=(B_p // Bb,),
        in_specs=[
            pl.BlockSpec((Bb, Lq_p, D_p), lambda b: (b, 0, 0)),
            pl.BlockSpec((Bb, Lk_p, D_p), lambda b: (b, 0, 0)),
            pl.BlockSpec((Bb, Lk_p, D_p), lambda b: (b, 0, 0)),
        ],
        out_specs=pl.BlockSpec((Bb, Lq_p, D_p), lambda b: (b, 0, 0)),
        compiler_params=pltpu.CompilerParams(
            dimension_semantics=("parallel",),
            vmem_limit_bytes=vmem_limit,
        ),
    )(q_p, k_p, v_p)

    return out_p[:B, :L, :D]


def _reference(query, key, value, top_k):
    """Pure-JAX reference mirroring the PyTorch forward."""
    scores = jnp.einsum("bld,bmd->blm", query, key)
    top_vals, _ = lax.top_k(scores, top_k)
    kth = top_vals[..., -1:]
    sparse = jnp.where(scores >= kth, scores, 0.0)
    norm = jnp.sqrt(jnp.sum(sparse * sparse, axis=1, keepdims=True))
    weights = sparse / jnp.maximum(norm, 1e-12)
    return jnp.einsum("blm,bmd->bld", weights, value)


if __name__ == "__main__":
    # ProbSparseAttention has no learnable parameters (only the top_k hyper-param).
    TOP_K = 3
    B, L, D = 8, 10, 300  # small version of the module's (128, 10, 300) input

    kq, kk, kv = jax.random.split(jax.random.PRNGKey(0), 3)
    q = jax.random.normal(kq, (B, L, D), dtype=jnp.float32)
    k = jax.random.normal(kk, (B, L, D), dtype=jnp.float32)
    v = jax.random.normal(kv, (B, L, D), dtype=jnp.float32)

    out = prob_sparse_attention(q, k, v, top_k=TOP_K, block_b=4)
    out = jax.block_until_ready(out)

    ref = _reference(q, k, v, TOP_K)
    assert out.shape == (B, L, D)
    assert jnp.allclose(out, ref, atol=2e-3, rtol=2e-3), "mismatch vs reference"

    print("KERNEL_OK")
</pallas_src>

<mosaic_0001>
module attributes {stable_mosaic.version = 11 : i64} {
  func.func @_prob_sparse_attn_kernel(%arg0: i32, %arg1: memref<4x16x384xf32, #tpu.memory_space<vmem>>, %arg2: memref<4x128x384xf32, #tpu.memory_space<vmem>>, %arg3: memref<4x128x384xf32, #tpu.memory_space<vmem>>, %arg4: memref<4x16x384xf32, #tpu.memory_space<vmem>>) attributes {dimension_semantics = [#tpu.dimension_semantics<parallel>], iteration_bounds = array<i64: 2>, scalar_prefetch = 0 : i64, scratch_operands = 0 : i64, tpu.core_type = #tpu.core_type<tc>, window_params = [{transform_indices = @transform_0, window_bounds = array<i64: 4, 16, 384>}, {transform_indices = @transform_1, window_bounds = array<i64: 4, 128, 384>}, {transform_indices = @transform_2, window_bounds = array<i64: 4, 128, 384>}, {transform_indices = @transform_3, window_bounds = array<i64: 4, 16, 384>}]} {
    %c0 = arith.constant 0 : index
    %c0_0 = arith.constant 0 : index
    %c0_1 = arith.constant 0 : index
    %0 = vector.load %arg1[%c0, %c0_0, %c0_1] : memref<4x16x384xf32, #tpu.memory_space<vmem>>, vector<4x16x384xf32>
    %c0_2 = arith.constant 0 : index
    %c0_3 = arith.constant 0 : index
    %c0_4 = arith.constant 0 : index
    %1 = vector.load %arg2[%c0_2, %c0_3, %c0_4] : memref<4x128x384xf32, #tpu.memory_space<vmem>>, vector<4x128x384xf32>
    %c0_5 = arith.constant 0 : index
    %c0_6 = arith.constant 0 : index
    %c0_7 = arith.constant 0 : index
    %2 = vector.load %arg3[%c0_5, %c0_6, %c0_7] : memref<4x128x384xf32, #tpu.memory_space<vmem>>, vector<4x128x384xf32>
    "tpu.trace_start"() <{level = 10 : i32, message = "bqd,bkd->bqk"}> : () -> ()
    %cst = arith.constant dense<0.000000e+00> : vector<4x16x128xf32>
    %3 = tpu.matmul %0, %1, %cst {dimension_numbers = #tpu.dot_dimension_numbers<[2], [2], [1], [1], [0, 0, 0, 1, 1, 1], [0], [0]>} : vector<4x16x384xf32>, vector<4x128x384xf32>, vector<4x16x128xf32> -> vector<4x16x128xf32>
    "tpu.trace_stop"() : () -> ()
    %4 = tpu.iota {dimensions = array<i32: 2>} : vector<4x16x128xi32>
    %c10_i32 = arith.constant 10 : i32
    %5 = vector.broadcast %c10_i32 : i32 to vector<4x16x128xi32>
    %6 = arith.cmpi slt, %4, %5 : vector<4x16x128xi32>
    %cst_8 = arith.constant 0xFF800000 : f32
    %7 = vector.broadcast %cst_8 : f32 to vector<4x16x128xf32>
    %8 = arith.select %6, %3, %7 : vector<4x16x128xi1>, vector<4x16x128xf32>
    %cst_9 = arith.constant 0x7F800000 : f32
    %9 = vector.broadcast %cst_9 : f32 to vector<4x16x1xf32>
    %cst_10 = arith.constant 0xFF800000 : f32
    %c0_i32 = arith.constant 0 : i32
    %10 = vector.broadcast %9 : vector<4x16x1xf32> to vector<4x16x128xf32>
    %11 = arith.cmpf olt, %8, %10 : vector<4x16x128xf32>
    %12 = vector.broadcast %cst_10 : f32 to vector<4x16x128xf32>
    %13 = arith.select %11, %8, %12 : vector<4x16x128xi1>, vector<4x16x128xf32>
    %cst_11 = arith.constant dense<0xFF800000> : vector<4x16xf32>
    %14 = vector.multi_reduction <maximumf>, %13, %cst_11 [2] : vector<4x16x128xf32> to vector<4x16xf32>
    %15 = vector.shape_cast %14 : vector<4x16xf32> to vector<4x16x1xf32>
    %c1_i32 = arith.constant 1 : i32
    %16 = vector.broadcast %15 : vector<4x16x1xf32> to vector<4x16x128xf32>
    %17 = arith.cmpf olt, %8, %16 : vector<4x16x128xf32>
    %18 = vector.broadcast %cst_10 : f32 to vector<4x16x128xf32>
    %19 = arith.select %17, %8, %18 : vector<4x16x128xi1>, vector<4x16x128xf32>
    %cst_12 = arith.constant dense<0xFF800000> : vector<4x16xf32>
    %20 = vector.multi_reduction <maximumf>, %19, %cst_12 [2] : vector<4x16x128xf32> to vector<4x16xf32>
    %21 = vector.shape_cast %20 : vector<4x16xf32> to vector<4x16x1xf32>
    %c2_i32 = arith.constant 2 : i32
    %22 = vector.broadcast %21 : vector<4x16x1xf32> to vector<4x16x128xf32>
    %23 = arith.cmpf olt, %8, %22 : vector<4x16x128xf32>
    %24 = vector.broadcast %cst_10 : f32 to vector<4x16x128xf32>
    %25 = arith.select %23, %8, %24 : vector<4x16x128xi1>, vector<4x16x128xf32>
    %cst_13 = arith.constant dense<0xFF800000> : vector<4x16xf32>
    %26 = vector.multi_reduction <maximumf>, %25, %cst_13 [2] : vector<4x16x128xf32> to vector<4x16xf32>
    %27 = vector.shape_cast %26 : vector<4x16xf32> to vector<4x16x1xf32>
    %28 = vector.broadcast %27 : vector<4x16x1xf32> to vector<4x16x128xf32>
    %29 = arith.cmpf oge, %8, %28 : vector<4x16x128xf32>
    %30 = arith.andi %29, %6 : vector<4x16x128xi1>
    %cst_14 = arith.constant 0.000000e+00 : f32
    %31 = vector.broadcast %cst_14 : f32 to vector<4x16x128xf32>
    %32 = arith.select %30, %8, %31 : vector<4x16x128xi1>, vector<4x16x128xf32>
    %33 = arith.mulf %32, %32 : vector<4x16x128xf32>
    %cst_15 = arith.constant dense<0.000000e+00> : vector<4x128xf32>
    %34 = vector.multi_reduction <add>, %33, %cst_15 [1] : vector<4x16x128xf32> to vector<4x128xf32>
    %35 = vector.shape_cast %34 : vector<4x128xf32> to vector<4x1x128xf32>
    %36 = math.sqrt %35 : vector<4x1x128xf32>
    %cst_16 = arith.constant 9.99999996E-13 : f32
    %37 = vector.broadcast %cst_16 : f32 to vector<4x1x128xf32>
    %38 = arith.maximumf %36, %37 : vector<4x1x128xf32>
    %39 = vector.broadcast %38 : vector<4x1x128xf32> to vector<4x16x128xf32>
    %40 = arith.divf %32, %39 : vector<4x16x128xf32>
    "tpu.trace_start"() <{level = 10 : i32, message = "bqk,bkd->bqd"}> : () -> ()
    %cst_17 = arith.constant dense<0.000000e+00> : vector<4x16x384xf32>
    %41 = tpu.matmul %40, %2, %cst_17 {dimension_numbers = #tpu.dot_dimension_numbers<[2], [1], [1], [2], [0, 0, 0, 1, 1, 2], [0], [0]>} : vector<4x16x128xf32>, vector<4x128x384xf32>, vector<4x16x384xf32> -> vector<4x16x384xf32>
    "tpu.trace_stop"() : () -> ()
    %c0_18 = arith.constant 0 : index
    %c0_19 = arith.constant 0 : index
    %c0_20 = arith.constant 0 : index
    %42 = vector.load %arg4[%c0_18, %c0_19, %c0_20] : memref<4x16x384xf32, #tpu.memory_space<vmem>>, vector<4x16x384xf32>
    tpu.vector_store %arg4[%c0_18, %c0_19, %c0_20], %41 {strides = array<i32>} : memref<4x16x384xf32, #tpu.memory_space<vmem>>, vector<4x16x384xf32>,
    return
  }
  func.func @transform_0(%arg0: i32) -> (i32, i32, i32) {
    %c0_i32 = arith.constant 0 : i32
    %c0_i32_0 = arith.constant 0 : i32
    %c0_i32_1 = arith.constant 0 : i32
    return %arg0, %c0_i32, %c0_i32_0 : i32, i32, i32
  }
  func.func @transform_1(%arg0: i32) -> (i32, i32, i32) {
    %c0_i32 = arith.constant 0 : i32
    %c0_i32_0 = arith.constant 0 : i32
    %c0_i32_1 = arith.constant 0 : i32
    return %arg0, %c0_i32, %c0_i32_0 : i32, i32, i32
  }
  func.func @transform_2(%arg0: i32) -> (i32, i32, i32) {
    %c0_i32 = arith.constant 0 : i32
    %c0_i32_0 = arith.constant 0 : i32
    %c0_i32_1 = arith.constant 0 : i32
    return %arg0, %c0_i32, %c0_i32_0 : i32, i32, i32
  }
  func.func @transform_3(%arg0: i32) -> (i32, i32, i32) {
    %c0_i32 = arith.constant 0 : i32
    %c0_i32_0 = arith.constant 0 : i32
    %c0_i32_1 = arith.constant 0 : i32
    return %arg0, %c0_i32, %c0_i32_0 : i32, i32, i32
  }
}

</mosaic_0001>

<bundles_post_ra>
// kernel: tpu_custom_call.1
= control target key start
LH: loop header
LB: loop body
LE: loop exit
PB: predicated region body
PF: predicated region fallthrough
CT: control target
= control target key end

     0   :  { %s3814_s0 = inlined_call_operand.hbm [shape: f32[8,16,384], index: 0, kind: input, shape index: {}]   ;;  %s3815_s1 = inlined_call_operand.hbm [shape: f32[8,128,384], index: 1, kind: input, shape index: {}]   ;;  %s3816_s2 = inlined_call_operand.hbm [shape: f32[8,128,384], index: 2, kind: input, shape index: {}]   ;;  %s3817_s3 = inlined_call_operand.hbm [shape: f32[8,16,384], index: 3, kind: output, shape index: {}]  }
   0x1   :  { %3824 = sst [smem:[#allocation14_spill]] %s3815_s1 }
   0x2   :  { %8 = vsyncpa [#allocation3], 0 }
   0x3   :  { %10 = vsyncpa [#allocation3 + $0x1], 0 }
   0x4   :  { %11 = vsyncpa [#allocation6], 0 }
   0x5   :  { %13 = vsyncpa [#allocation6 + $0x1], 0 }
   0x6   :  { %14 = vsyncpa [#allocation4], 0 }
   0x7   :  { %16 = vsyncpa [#allocation4 + $0x1], 0  ;;  %s2966_s12 = smov 0   ;;  %s2968_s13 = smov 0  }
   0x8   :  { %s2970_s14 = smov 0   ;;  %s2972_s15 = smov 0  }
   0x9 LB: > { %3825 = sst [smem:[#allocation12_spill]] %s2931_s14  ;;  %s2987_s16 = sadd.s32 4294967295, %s2935_s15   ;;  %s2935_s15 = sphi %s2972_s15, %s3845_s15   ;;  %s2931_s14 = sphi %s2970_s14, %s3842_s14   ;;  %s2927_s13 = sphi %s2968_s13, %s3844_s13   ;;  %s2923_s12 = sphi %s2966_s12, %s3843_s12  }
   0xa   : > { %s2255_s17 = sadd.s32 4294967294, %s2935_s15   ;;  %s2991_s18 = sadd.s32 1, %s2935_s15  }
   0xb   : > { %s29_s19 = sadd.s32 1, %s2931_s14  ;;  %s26_s20 = ssub.s32 %s2935_s15, %s2991_s18 }
   0xc   : > { %p36_p0 = scmp.ne.s32.totalorder %s2931_s14, %s2927_s13  ;;  %p27_p1 = scmp.eq.s32.totalorder %s26_s20, 0 }
   0xd   : > { %p37_p2 = scmp.eq.s32.totalorder %s2935_s15, 0  ;;  %p42_p3 = scmp.ne.s32.totalorder %s2927_s13, %s2923_s12 }
   0xe   : > { %p43_p4 = scmp.eq.s32.totalorder %s2987_s16, 0  ;;  %p118_p7 = scmp.eq.s32.totalorder %s2987_s16, 1 }
   0xf   : > { %s3003_s21 = scalar_select %p27_p1, %s2931_s14, %s29_s19  }
  0x10   : > { %p38_p5 = por %p37_p2, %p36_p0  ;;  %p3005_p6 = por %p43_p4, %p42_p3 }
  0x11   : > { %3826 = sst [smem:[#allocation13_spill]] %s3003_s21  ;;  %p124_p8 = scmp.eq.s32.totalorder %s2255_s17, 1 }
  0x12   : > { %s3827_s22 = scalar_select %p3005_p6, 1, 0 }
  0x13   : > { %p2728_p10 = scmp.lt.s32.totalorder %s2935_s15, 2  ;;  %p3012_p11 = por %p118_p7, %p36_p0 }
  0x14   : > { %p3016_p12 = por %p124_p8, %p42_p3  ;;  %s3021_s25 = sand.u32 1, %s2931_s14  }
  0x15   : > { %s3828_s23 = scalar_select %p3012_p11, 1, 0 }
  0x16   : > { %s3829_s24 = scalar_select %p3016_p12, 1, 0 }
  0x17   : > { %p3023_p13 = pnand %p2728_p10, %p38_p5  ;;  %s166_s27 = sand.u32 1, %s2935_s15  }
  0x18   : > { %s3820_s28 = smul.u32 1536, %s3021_s25  ;;  %p2267_p0 = scmp.ge.s32.totalorder %s2935_s15, 1 }
  0x19   : > { %s2700_s29 = smul.u32 24576, %s2935_s15  ;;  %p208_p1 = scmp.lt.s32.totalorder %s2935_s15, 3 }
  0x1a   : > { %s3831_s1 = sld [smem:[#allocation14_spill]]  ;;  %s170_s6 = scalar_lea.vmem [#allocation5], %s3820_s28 }
  0x1b   : > { %s178_s7 = sshll.u32 %s170_s6, 4  ;;  %p3043_p2 = pnand %p2267_p0, %p208_p1  ;;  %s3041_s7 = int_to_ptr.vmem [resolvable:$true] %s178_s7 }
  0x1c   : > { %s3047_s9 = scalar_lea.sflag [#allocation6], %s166_s27  ;;  %p3053_p4 = pneg %p3023_p13 }
  0x1d   : > { %s3832_s8 = scalar_select %p3043_p2, 1, 0 }
  0x20   : > { %s3037_s5 = scalar_lea.hbm %s3831_s1, %s2700_s29  ;;  %s2788_s20 = scalar_lea.hbm %s3831_s1, 49152 }
  0x21   : > { %s2783_s10 = scalar_lea.hbm %s3037_s5, 24576  ;;  %p2789_p8 = scmp.lt.s32.totalorder %s3037_s5, %s3831_s1 }
  0x22   : > { %p2784_p3 = scmp.ne.s32.totalorder %s3037_s5, %s2783_s10  ;;  %p2790_p10 = scmp.lt.s32.totalorder %s2788_s20, %s2783_s10 }
  0x24   : > { %p2786_p5 = pnand %p3053_p4, %p2784_p3  ;;  %p2791_p0 = por %p2790_p10, %p2789_p8 }
  0x26   : > { %p2787_p7 = pneg %p2786_p5 }
  0x28   : > { %p2792_p1 = pnand %p2791_p0, %p2787_p7 }
  0x2a   : > { %2795 = shalt.err (!%p2792_p1)
}
  0x2b   : > { %s2796_s27 = scalar_lea.vmem %s3041_s7, 24576  ;;  %s2937_s6 = smov [#allocation5]  }
  0x2c   : > { %p2797_p9 = scmp.ne.s32.totalorder %s3041_s7, %s2796_s27  ;;  %s2801_s17 = sshll.u32 %s2937_s6, 4  ;;  %s2802_s17 = int_to_ptr.vmem [resolvable:$false] %s2801_s17 }
  0x2d   : > { %s2803_s19 = scalar_lea.vmem %s2802_s17, 49152  ;;  %p2804_p12 = scmp.lt.s32.totalorder %s3041_s7, %s2802_s17 }
  0x2e   : > { %p2799_p3 = pnand %p2797_p9, %p3053_p4  ;;  %p2805_p11 = scmp.lt.s32.totalorder %s2803_s19, %s2796_s27 }
  0x30   : > { %p2800_p5 = pneg %p2799_p3  ;;  %p2806_p6 = por %p2805_p11, %p2804_p12 }
  0x32   : > { %p2807_p2 = pnand %p2806_p6, %p2800_p5 }
  0x34   : > { %2810 = shalt.err (!%p2807_p2)
}
  0x35   : > { %s3822_s10 = smov 384   ;;  %s2939_s20 = smov 24  }
  0x36   : > { %2720 = dma.hbm_to_vmem [thread:$0]  (!%p3023_p13), %s3037_s5, 24576, %s3041_s7, %s3047_s9, %s3822_s10, %s3822_s10, %s2939_s20  }
  0x37   : > { %s2697_s30 = smul.u32 192, %s3021_s25  ;;  %s3086_s17 = scalar_lea.hbm %s3816_s2, %s2700_s29 }
  0x38   : > { %s2698_s4 = smul.u32 3072, %s2935_s15  ;;  %s145_s27 = scalar_lea.sflag [#allocation3], %s3021_s25 }
  0x39   : > { %s148_s21 = scalar_lea.vmem [#allocation2], %s2697_s30  ;;  %s3834_s5 = smul.u32 1536, %s3021_s25 }
  0x3a   : > { %s3091_s1 = scalar_lea.hbm %s3814_s0, %s2698_s4  ;;  %s156_s14 = sshll.u32 %s148_s21, 4  ;;  %s3093_s14 = int_to_ptr.vmem [resolvable:$true] %s156_s14 }
  0x3b   : > { %s3097_s7 = scalar_lea.vmem [#allocation7], %s3834_s5  ;;  %s2811_s29 = scalar_lea.hbm %s3091_s1, 3072 }
  0x3c   : > { %s200_s10 = sshll.u32 %s3097_s7, 4  ;;  %p2812_p6 = scmp.ne.s32.totalorder %s3091_s1, %s2811_s29  ;;  %s201_s10 = int_to_ptr.vmem [resolvable:$true] %s200_s10 }
  0x3d   : > { %s2816_s6 = scalar_lea.hbm %s3814_s0, 6144  ;;  %p2817_p12 = scmp.lt.s32.totalorder %s3091_s1, %s3814_s0 }
  0x3e   : > { %p2814_p9 = pnand %p2812_p6, %p3053_p4  ;;  %p2818_p2 = scmp.lt.s32.totalorder %s2816_s6, %s2811_s29 }
  0x40   : > { %p2815_p11 = pneg %p2814_p9  ;;  %p2819_p7 = por %p2818_p2, %p2817_p12 }
  0x42   : > { %p2820_p8 = pnand %p2819_p7, %p2815_p11 }
  0x44   : > { %2823 = shalt.err (!%p2820_p8)
}
  0x45   : > { %s2824_s21 = scalar_lea.vmem %s3093_s14, 3072  ;;  %s2940_s25 = smov [#allocation2]  }
  0x46   : > { %p2825_p10 = scmp.ne.s32.totalorder %s3093_s14, %s2824_s21  ;;  %s2829_s5 = sshll.u32 %s2940_s25, 4  ;;  %s2830_s5 = int_to_ptr.vmem [resolvable:$false] %s2829_s5 }
  0x47   : > { %s2831_s28 = scalar_lea.vmem %s2830_s5, 6144  ;;  %p2832_p3 = scmp.lt.s32.totalorder %s3093_s14, %s2830_s5 }
  0x48   : > { %p2827_p0 = pnand %p2825_p10, %p3053_p4  ;;  %p2833_p5 = scmp.lt.s32.totalorder %s2831_s28, %s2824_s21 }
  0x4a   : > { %p2828_p1 = pneg %p2827_p0  ;;  %p2834_p6 = por %p2833_p5, %p2832_p3 }
  0x4c   : > { %p2835_p9 = pnand %p2834_p6, %p2828_p1 }
  0x4e   : > { %2838 = shalt.err (!%p2835_p9)
}
  0x4f   : > { %s3835_s29 = smov 384   ;;  %s2839_s4 = scalar_lea.hbm %s3086_s17, 24576 }
  0x50   : > { %2717 = dma.hbm_to_vmem [thread:$0]  (!%p3023_p13), %s3091_s1, 3072, %s3093_s14, %s145_s27, %s3835_s29, %s3835_s29, %s2939_s20  }
  0x51   : > { %p2840_p11 = scmp.ne.s32.totalorder %s3086_s17, %s2839_s4  ;;  %s2844_s30 = scalar_lea.hbm %s3816_s2, 49152 }
  0x52   : > { %p2845_p7 = scmp.lt.s32.totalorder %s3086_s17, %s3816_s2  ;;  %p2846_p8 = scmp.lt.s32.totalorder %s2844_s30, %s2839_s4 }
  0x53   : > { %p2842_p12 = pnand %p2840_p11, %p3053_p4 }
  0x54   : > { %p2847_p10 = por %p2846_p8, %p2845_p7 }
  0x55   : > { %p2843_p2 = pneg %p2842_p12 }
  0x57   : > { %p2848_p0 = pnand %p2847_p10, %p2843_p2 }
  0x59   : > { %2851 = shalt.err (!%p2848_p0)
}
  0x5a   : > { %s2852_s1 = scalar_lea.vmem %s201_s10, 24576  ;;  %s2941_s14 = smov [#allocation7]  }
  0x5b   : > { %p2853_p1 = scmp.ne.s32.totalorder %s201_s10, %s2852_s1  ;;  %s2857_s7 = sshll.u32 %s2941_s14, 4  ;;  %s2858_s7 = int_to_ptr.vmem [resolvable:$false] %s2857_s7 }
  0x5c   : > { %s2859_s27 = scalar_lea.vmem %s2858_s7, 49152  ;;  %p2860_p6 = scmp.lt.s32.totalorder %s201_s10, %s2858_s7 }
  0x5d   : > { %p2855_p3 = pnand %p2853_p1, %p3053_p4  ;;  %p2861_p9 = scmp.lt.s32.totalorder %s2859_s27, %s2852_s1 }
  0x5f   : > { %p2856_p5 = pneg %p2855_p3  ;;  %p2862_p11 = por %p2861_p9, %p2860_p6 }
  0x61   : > { %p2863_p12 = pnand %p2862_p11, %p2856_p5 }
  0x63   : > { %2866 = shalt.err (!%p2863_p12)
}
  0x64   : > { %2723 = dma.hbm_to_vmem [thread:$0]  (!%p3023_p13), %s3086_s17, 24576, %s201_s10, %s3047_s9, %s3835_s29, %s3835_s29, %s2939_s20  }
  0x65   : > { %p3836_p4 = scmp.ne.s32.totalorder %s3832_s8, 0 }
  0x66   : > { %s3149_s11 = sand.u32 (!%p3836_p4), 1, %s2927_s13   ;;  %p3837_p2 = scmp.ne.s32.totalorder (!%p3836_p4), %s3827_s22, 0 }
  0x67   : > { %212 = sbr.rel (%p3836_p4) target bundleno = 1258 (0x4ea), region = 32  ;;  %s215_s28 = scalar_lea.sflag (!%p3836_p4), [#allocation3], %s3149_s11 }
  0x68   : > { %s2703_s5 = smul.u32 (!%p3836_p4), 192, %s3149_s11 }
  0x6a   : > { %s3155_s26 = scalar_lea.vmem (!%p3836_p4), [#allocation2], %s2703_s5 }
  0x6c   : > { %2910 = dma.done.wait (%p3837_p2), %s215_s28, 3072  }
  0x6d   : > { %2912 = vsyncadd (%p3837_p2), %s215_s28, 4294964224  ;;  %s223_s8 = sand.u32 1, %s2987_s16   ;;  %s2704_s9 = smul.u32 1536, %s3149_s11 }
  0x6e   : > { %s224_s10 = scalar_lea.sflag [#allocation6], %s223_s8 }
  0x6f   : > { %s3165_s20 = scalar_lea.vmem [#allocation5], %s2704_s9 }
  0x70   : > { %2914 = dma.done.wait (%p3837_p2), %s224_s10, 49152  }
  0x71   : > { %2916 = vsyncadd (%p3837_p2), %s224_s10, 4294918144  ;;  %v343_v0 = vld [vmem:[%s3165_s20 + $0x170] sm:$0xff]  ;;  %v344_v1 = vld [vmem:[%s3165_s20 + $0x178] sm:$0xff]  ;;  %s3456_s22 = scalar_lea.vmem [#allocation7], %s2704_s9  ;;  %s3738_s17 = scalar_lea.vmem [#allocation8], %s2703_s5 }
  0x72   : > { %v342_v2 = vld [vmem:[%s3165_s20 + $0x168] sm:$0xff]  ;;  %681 = vmatprep.subr.mxu0 %v343_v0  ;;  %2417 = vmatprep.subr.mxu1 %v344_v1  ;;  %v340_v3 = vld [vmem:[%s3165_s20 + $0x158] sm:$0xff]  ;;  %v341_v4 = vld [vmem:[%s3165_s20 + $0x160] sm:$0xff]  ;;  %s2705_s29 = smul.u32 3072, %s2987_s16  ;;  %s2139_s4 = sshll.u32 %s3738_s17, 4  ;;  %s3769_s4 = int_to_ptr.vmem [resolvable:$true] %s2139_s4 }
  0x73   : > { %682 = vmatpush1.xpose.msra.mxu0 %v342_v2  ;;  %2418 = vmatpush3.xpose.msra.mxu1 %v344_v1  ;;  %v339_v5 = vld [vmem:[%s3165_s20 + $0x150] sm:$0xff]  ;;  %v337_v6 = vld [vmem:[%s3165_s20 + $0x140] sm:$0xff]  ;;  %v338_v7 = vld [vmem:[%s3165_s20 + $0x148] sm:$0xff]  ;;  %s2125_s16 = scalar_lea.sflag [#allocation4], %s3149_s11  ;;  %s2867_s21 = scalar_lea.vmem %s3769_s4, 3072 }
  0x74   : > { %683 = vmatprep.subr.mxu0 %v340_v3  ;;  %2419 = vmatprep.subr.mxu1 %v341_v4  ;;  %v336_v8 = vld [vmem:[%s3165_s20 + $0x138] sm:$0xff]  ;;  %v334_v9 = vld [vmem:[%s3165_s20 + $0x128] sm:$0xff]  ;;  %v335_v10 = vld [vmem:[%s3165_s20 + $0x130] sm:$0xff]  ;;  %s3767_s30 = scalar_lea.hbm %s3817_s3, %s2705_s29  ;;  %p2868_p13 = scmp.ne.s32.totalorder %s3769_s4, %s2867_s21 }
  0x75   : > { %v333_v11 = vld [vmem:[%s3165_s20 + $0x120] sm:$0xff]  ;;  %v331_v12 = vld [vmem:[%s3165_s20 + $0x110] sm:$0xff]  ;;  %v332_v13 = vld [vmem:[%s3165_s20 + $0x118] sm:$0xff]  ;;  %p3838_p7 = scmp.ne.s32.totalorder %s3828_s23, 0  ;;  %s2943_s25 = smov [#allocation8]  }
  0x76   : > { %v330_v14 = vld [vmem:[%s3165_s20 + $0x108] sm:$0xff]  ;;  %v328_v15 = vld [vmem:[%s3165_s20 + $0xf8] sm:$0xff]  ;;  %v329_v16 = vld [vmem:[%s3165_s20 + $0x100] sm:$0xff]  ;;  %s2871_s1 = sshll.u32 %s2943_s25, 4  ;;  %s2872_s1 = int_to_ptr.vmem [resolvable:$false] %s2871_s1 }
  0x77   : > { %684 = vmatpush1.xpose.msra.mxu0 %v339_v5  ;;  %2420 = vmatpush3.xpose.msra.mxu1 %v341_v4  ;;  %v274_v17 = vld [vmem:[%s3155_s26 + $0x8] sm:$0xff]  ;;  %v275_v18 = vld [vmem:[%s3155_s26 + $0x10] sm:$0xff]  ;;  %v325_v20 = vld [vmem:[%s3165_s20 + $0xe0] sm:$0xff]  ;;  %p2869_p8 = pnand %p2868_p13, %p3838_p7  ;;  %s2873_s14 = scalar_lea.vmem %s2872_s1, 6144 }
  0x78   : > { %685 = vmatprep.subr.mxu0 %v337_v6  ;;  %2421 = vmatprep.subr.mxu1 %v338_v7  ;;  %v327_v19 = vld [vmem:[%s3165_s20 + $0xf0] sm:$0xff]  ;;  %v326_v21 = vld [vmem:[%s3165_s20 + $0xe8] sm:$0xff]  ;;  %v324_v22 = vld [vmem:[%s3165_s20 + $0xd8] sm:$0xff]  ;;  %p2874_p0 = scmp.lt.s32.totalorder %s3769_s4, %s2872_s1  ;;  %p2875_p1 = scmp.lt.s32.totalorder %s2873_s14, %s2867_s21 }
  0x79   : > { %745 = vmatprep.mubr.f32.mxu0 %v274_v17  ;;  %2449 = vmatprep.mubr.f32.mxu1 %v275_v18  ;;  %v322_v23 = vld [vmem:[%s3165_s20 + $0xc8] sm:$0xff]  ;;  %v323_v24 = vld [vmem:[%s3165_s20 + $0xd0] sm:$0xff]  ;;  %v321_v25 = vld [vmem:[%s3165_s20 + $0xc0] sm:$0xff]  ;;  %p2870_p10 = pneg %p2869_p8 }
  0x7a   : > { %v319_v26 = vld [vmem:[%s3165_s20 + $0xb0] sm:$0xff]  ;;  %v320_v27 = vld [vmem:[%s3165_s20 + $0xb8] sm:$0xff]  ;;  %v318_v28 = vld [vmem:[%s3165_s20 + $0xa8] sm:$0xff]  ;;  %p2876_p3 = por %p2875_p1, %p2874_p0 }
  0x7b   : > { %686 = vmatpush1.xpose.msra.mxu0 %v336_v8  ;;  %2422 = vmatpush3.xpose.msra.mxu1 %v338_v7  ;;  %v316_v29 = vld [vmem:[%s3165_s20 + $0x98] sm:$0xff]  ;;  %v317_v30 = vld [vmem:[%s3165_s20 + $0xa0] sm:$0xff]  ;;  %v315_v31 = vld [vmem:[%s3165_s20 + $0x90] sm:$0xff] }
  0x7c   : > { %687 = vmatprep.subr.mxu0 %v334_v9  ;;  %2423 = vmatprep.subr.mxu1 %v335_v10  ;;  %v313_v32 = vld [vmem:[%s3165_s20 + $0x80] sm:$0xff]  ;;  %v314_v33 = vld [vmem:[%s3165_s20 + $0x88] sm:$0xff]  ;;  %v312_v34 = vld [vmem:[%s3165_s20 + $0x78] sm:$0xff]  ;;  %p2877_p5 = pnand %p2876_p3, %p2870_p10 }
  0x7d   : > { %v310_v35 = vld [vmem:[%s3165_s20 + $0x68] sm:$0xff]  ;;  %v311_v36 = vld [vmem:[%s3165_s20 + $0x70] sm:$0xff]  ;;  %v309_v37 = vld [vmem:[%s3165_s20 + $0x60] sm:$0xff] }
  0x7e   : > { %v307_v38 = vld [vmem:[%s3165_s20 + $0x50] sm:$0xff]  ;;  %v308_v39 = vld [vmem:[%s3165_s20 + $0x58] sm:$0xff]  ;;  %v306_v40 = vld [vmem:[%s3165_s20 + $0x48] sm:$0xff] }
  0x7f   : > { %688 = vmatpush1.xpose.msra.mxu0 %v333_v11  ;;  %2424 = vmatpush3.xpose.msra.mxu1 %v335_v10  ;;  %v304_v41 = vld [vmem:[%s3165_s20 + $0x38] sm:$0xff]  ;;  %v305_v42 = vld [vmem:[%s3165_s20 + $0x40] sm:$0xff]  ;;  %v303_v43 = vld [vmem:[%s3165_s20 + $0x30] sm:$0xff] }
  0x80   : > { %689 = vmatprep.subr.mxu0 %v331_v12  ;;  %2425 = vmatprep.subr.mxu1 %v332_v13  ;;  %v301_v44 = vld [vmem:[%s3165_s20 + $0x20] sm:$0xff]  ;;  %v302_v45 = vld [vmem:[%s3165_s20 + $0x28] sm:$0xff]  ;;  %v300_v46 = vld [vmem:[%s3165_s20 + $0x18] sm:$0xff] }
  0x81   : > { %v298_v47 = vld [vmem:[%s3165_s20 + $0x8] sm:$0xff]  ;;  %v299_v48 = vld [vmem:[%s3165_s20 + $0x10] sm:$0xff]  ;;  %v297_v49 = vld [vmem:[%s3165_s20] sm:$0xff] }
  0x82   : > { %v391_v50 = vld [vmem:[%s3165_s20 + $0x2f0] sm:$0xff]  ;;  %v392_v51 = vld [vmem:[%s3165_s20 + $0x2f8] sm:$0xff]  ;;  %v273_v52 = vld [vmem:[%s3155_s26] sm:$0xff] }
  0x83   : > { %690 = vmatpush1.xpose.msra.mxu0 %v330_v14  ;;  %2426 = vmatpush3.xpose.msra.mxu1 %v332_v13  ;;  %v278_v53 = vld [vmem:[%s3155_s26 + $0x28] sm:$0xff]  ;;  %v277_v55 = vld [vmem:[%s3155_s26 + $0x20] sm:$0xff]  ;;  %v388_v56 = vld [vmem:[%s3165_s20 + $0x2d8] sm:$0xff] }
  0x84   : > { %691 = vmatprep.subr.mxu0 %v328_v15  ;;  %2427 = vmatprep.subr.mxu1 %v329_v16  ;;  %v390_v54 = vld [vmem:[%s3165_s20 + $0x2e8] sm:$0xff]  ;;  %v389_v57 = vld [vmem:[%s3165_s20 + $0x2e0] sm:$0xff]  ;;  %v276_v59 = vld [vmem:[%s3155_s26 + $0x18] sm:$0xff] }
  0x85   : > { %v281_v58 = vld [vmem:[%s3155_s26 + $0x40] sm:$0xff]  ;;  %v387_v60 = vld [vmem:[%s3165_s20 + $0x2d0] sm:$0xff]  ;;  %v386_v62 = vld [vmem:[%s3165_s20 + $0x2c8] sm:$0xff] }
  0x86   : > { %v385_v61 = vld [vmem:[%s3165_s20 + $0x2c0] sm:$0xff]  ;;  %v280_v63 = vld [vmem:[%s3155_s26 + $0x38] sm:$0xff]  ;;  %v382_v1 = vld [vmem:[%s3165_s20 + $0x2a8] sm:$0xff] }
  0x87   : > { %692 = vmatpush1.xpose.msra.mxu0 %v327_v19  ;;  %2428 = vmatpush3.xpose.msra.mxu1 %v329_v16  ;;  %v384_v0 = vld [vmem:[%s3165_s20 + $0x2b8] sm:$0xff]  ;;  %v383_v2 = vld [vmem:[%s3165_s20 + $0x2b0] sm:$0xff]  ;;  %v381_v3 = vld [vmem:[%s3165_s20 + $0x2a0] sm:$0xff] }
  0x88   : > { %693 = vmatprep.subr.mxu0 %v325_v20  ;;  %2429 = vmatprep.subr.mxu1 %v326_v21  ;;  %v379_v4 = vld [vmem:[%s3165_s20 + $0x290] sm:$0xff]  ;;  %v380_v5 = vld [vmem:[%s3165_s20 + $0x298] sm:$0xff]  ;;  %v378_v6 = vld [vmem:[%s3165_s20 + $0x288] sm:$0xff] }
  0x89   : > { %v376_v7 = vld [vmem:[%s3165_s20 + $0x278] sm:$0xff]  ;;  %v377_v8 = vld [vmem:[%s3165_s20 + $0x280] sm:$0xff]  ;;  %v375_v9 = vld [vmem:[%s3165_s20 + $0x270] sm:$0xff] }
  0x8a   : > { %v373_v10 = vld [vmem:[%s3165_s20 + $0x260] sm:$0xff]  ;;  %v374_v11 = vld [vmem:[%s3165_s20 + $0x268] sm:$0xff]  ;;  %v372_v12 = vld [vmem:[%s3165_s20 + $0x258] sm:$0xff] }
  0x8b   : > { %694 = vmatpush1.xpose.msra.mxu0 %v324_v22  ;;  %2430 = vmatpush3.xpose.msra.mxu1 %v326_v21  ;;  %v370_v13 = vld [vmem:[%s3165_s20 + $0x248] sm:$0xff]  ;;  %v371_v14 = vld [vmem:[%s3165_s20 + $0x250] sm:$0xff]  ;;  %v369_v15 = vld [vmem:[%s3165_s20 + $0x240] sm:$0xff] }
  0x8c   : > { %695 = vmatprep.subr.mxu0 %v322_v23  ;;  %2431 = vmatprep.subr.mxu1 %v323_v24  ;;  %v367_v16 = vld [vmem:[%s3165_s20 + $0x230] sm:$0xff]  ;;  %v368_v17 = vld [vmem:[%s3165_s20 + $0x238] sm:$0xff]  ;;  %v366_v18 = vld [vmem:[%s3165_s20 + $0x228] sm:$0xff] }
  0x8d   : > { %v364_v19 = vld [vmem:[%s3165_s20 + $0x218] sm:$0xff]  ;;  %v365_v20 = vld [vmem:[%s3165_s20 + $0x220] sm:$0xff]  ;;  %v363_v21 = vld [vmem:[%s3165_s20 + $0x210] sm:$0xff] }
  0x8e   : > { %v361_v22 = vld [vmem:[%s3165_s20 + $0x200] sm:$0xff]  ;;  %v362_v23 = vld [vmem:[%s3165_s20 + $0x208] sm:$0xff] }
  0x8f   : > { %696 = vmatpush1.xpose.msra.mxu0 %v321_v25  ;;  %2432 = vmatpush3.xpose.msra.mxu1 %v323_v24  ;;  %v360_v24 = vld [vmem:[%s3165_s20 + $0x1f8] sm:$0xff]  ;;  %v358_v25 = vld [vmem:[%s3165_s20 + $0x1e8] sm:$0xff] }
  0x90   : > { %697 = vmatprep.subr.mxu0 %v319_v26  ;;  %2433 = vmatprep.subr.mxu1 %v320_v27  ;;  %v359_v26 = vld [vmem:[%s3165_s20 + $0x1f0] sm:$0xff] }
  0x93   : > { %698 = vmatpush1.xpose.msra.mxu0 %v318_v28  ;;  %2434 = vmatpush3.xpose.msra.mxu1 %v320_v27  ;;  %v357_v27 = vld [vmem:[%s3165_s20 + $0x1e0] sm:$0xff]  ;;  %v355_v28 = vld [vmem:[%s3165_s20 + $0x1d0] sm:$0xff] }
  0x94   : > { %699 = vmatprep.subr.mxu0 %v316_v29  ;;  %2435 = vmatprep.subr.mxu1 %v317_v30  ;;  %v356_v29 = vld [vmem:[%s3165_s20 + $0x1d8] sm:$0xff] }
  0x97   : > { %700 = vmatpush1.xpose.msra.mxu0 %v315_v31  ;;  %2436 = vmatpush3.xpose.msra.mxu1 %v317_v30  ;;  %v354_v30 = vld [vmem:[%s3165_s20 + $0x1c8] sm:$0xff]  ;;  %v352_v31 = vld [vmem:[%s3165_s20 + $0x1b8] sm:$0xff] }
  0x98   : > { %701 = vmatprep.subr.mxu0 %v313_v32  ;;  %2437 = vmatprep.subr.mxu1 %v314_v33  ;;  %v353_v32 = vld [vmem:[%s3165_s20 + $0x1c0] sm:$0xff] }
  0x9b   : > { %702 = vmatpush1.xpose.msra.mxu0 %v312_v34  ;;  %2438 = vmatpush3.xpose.msra.mxu1 %v314_v33  ;;  %v351_v33 = vld [vmem:[%s3165_s20 + $0x1b0] sm:$0xff]  ;;  %v349_v34 = vld [vmem:[%s3165_s20 + $0x1a0] sm:$0xff] }
  0x9c   : > { %703 = vmatprep.subr.mxu0 %v310_v35  ;;  %2439 = vmatprep.subr.mxu1 %v311_v36  ;;  %v350_v35 = vld [vmem:[%s3165_s20 + $0x1a8] sm:$0xff] }
  0x9f   : > { %704 = vmatpush1.xpose.msra.mxu0 %v309_v37  ;;  %2440 = vmatpush3.xpose.msra.mxu1 %v311_v36  ;;  %v348_v36 = vld [vmem:[%s3165_s20 + $0x198] sm:$0xff]  ;;  %v346_v37 = vld [vmem:[%s3165_s20 + $0x188] sm:$0xff] }
  0xa0   : > { %705 = vmatprep.subr.mxu0 %v307_v38  ;;  %2441 = vmatprep.subr.mxu1 %v308_v39  ;;  %v347_v38 = vld [vmem:[%s3165_s20 + $0x190] sm:$0xff] }
  0xa3   : > { %706 = vmatpush1.xpose.msra.mxu0 %v306_v40  ;;  %2442 = vmatpush3.xpose.msra.mxu1 %v308_v39  ;;  %v345_v39 = vld [vmem:[%s3165_s20 + $0x180] sm:$0xff]  ;;  %v439_v40 = vld [vmem:[%s3165_s20 + $0x470] sm:$0xff] }
  0xa4   : > { %707 = vmatprep.subr.mxu0 %v304_v41  ;;  %2443 = vmatprep.subr.mxu1 %v305_v42  ;;  %v440_v41 = vld [vmem:[%s3165_s20 + $0x478] sm:$0xff] }
  0xa7   : > { %708 = vmatpush1.xpose.msra.mxu0 %v303_v43  ;;  %2444 = vmatpush3.xpose.msra.mxu1 %v305_v42  ;;  %v279_v42 = vld [vmem:[%s3155_s26 + $0x30] sm:$0xff]  ;;  %v284_v43 = vld [vmem:[%s3155_s26 + $0x58] sm:$0xff] }
  0xa8   : > { %709 = vmatprep.subr.mxu0 %v301_v44  ;;  %2445 = vmatprep.subr.mxu1 %v302_v45  ;;  %v438_v44 = vld [vmem:[%s3165_s20 + $0x468] sm:$0xff] }
  0xab   : > { %710 = vmatpush1.xpose.msra.mxu0 %v300_v46  ;;  %2446 = vmatpush3.xpose.msra.mxu1 %v302_v45  ;;  %v283_v45 = vld [vmem:[%s3155_s26 + $0x50] sm:$0xff]  ;;  %v436_v46 = vld [vmem:[%s3165_s20 + $0x458] sm:$0xff] }
  0xac   : > { %711 = vmatprep.subr.mxu0 %v298_v47  ;;  %2447 = vmatprep.subr.mxu1 %v299_v48  ;;  %v437_v47 = vld [vmem:[%s3165_s20 + $0x460] sm:$0xff] }
  0xaf   : > { %712 = vmatpush1.xpose.msra.mxu0 %v297_v49  ;;  %2448 = vmatpush3.xpose.msra.mxu1 %v299_v48  ;;  %v287_v48 = vld [vmem:[%s3155_s26 + $0x70] sm:$0xff]  ;;  %v282_v49 = vld [vmem:[%s3155_s26 + $0x48] sm:$0xff] }
  0xb0   : > { %831 = vmatprep.subr.mxu0 %v391_v50  ;;  %2452 = vmatprep.subr.mxu1 %v392_v51  ;;  %v435_v50 = vld [vmem:[%s3165_s20 + $0x450] sm:$0xff] }
  0xb2   : > { %746 = vmatmul.mubr.f32.vlgmr.msra.gmra.mxu0 %v273_v52  ;;  %2450 = vmatmul.mubr.f32.vlgmr.msra.gmra.mxu1 %v278_v53  ;;  %v434_v52 = vld [vmem:[%s3165_s20 + $0x448] sm:$0xff] }
  0xb3   : > { %832 = vmatpush1.xpose.msra.mxu0 %v390_v54  ;;  %2453 = vmatpush3.xpose.msra.mxu1 %v392_v51  ;;  %v433_v51 = vld [vmem:[%s3165_s20 + $0x440] sm:$0xff]  ;;  %v286_v53 = vld [vmem:[%s3155_s26 + $0x68] sm:$0xff]  ;;  %v432_v54 = vld [vmem:[%s3165_s20 + $0x438] sm:$0xff] }
  0xb4   : > { %750 = vmatprep.mubr.f32.mxu0 %v277_v55  ;;  %833 = vmatprep.subr.mxu0 %v388_v56  ;;  %v430_v55 = vld [vmem:[%s3165_s20 + $0x428] sm:$0xff]  ;;  %v431_v56 = vld [vmem:[%s3165_s20 + $0x430] sm:$0xff] }
  0xb5   : > { %2454 = vmatprep.subr.mxu1 %v389_v57  ;;  %2484 = vmatprep.mubr.f32.mxu1 %v281_v58  ;;  %v427_v58 = vld [vmem:[%s3165_s20 + $0x410] sm:$0xff] }
  0xb6   : > { %751 = vmatmul.mubr.f32.gmra.mxu0 %v276_v59  ;;  %v428_v59 = vld [vmem:[%s3165_s20 + $0x418] sm:$0xff] }
  0xb7   : > { %834 = vmatpush1.xpose.msra.mxu0 %v387_v60  ;;  %2455 = vmatpush3.xpose.msra.mxu1 %v389_v57  ;;  %v429_v57 = vld [vmem:[%s3165_s20 + $0x420] sm:$0xff]  ;;  %v426_v60 = vld [vmem:[%s3165_s20 + $0x408] sm:$0xff] }
  0xb8   : > { %835 = vmatprep.subr.mxu0 %v385_v61  ;;  %2456 = vmatprep.subr.mxu1 %v386_v62  ;;  %v424_v61 = vld [vmem:[%s3165_s20 + $0x3f8] sm:$0xff] }
  0xb9   : > { %895 = vmatprep.mubr.f32.mxu0 %v280_v63  ;;  %v423_v63 = vld [vmem:[%s3165_s20 + $0x3f0] sm:$0xff] }
  0xbb   : > { %836 = vmatpush1.xpose.msra.mxu0 %v384_v0  ;;  %2457 = vmatpush3.xpose.msra.mxu1 %v386_v62  ;;  %v425_v62 = vld [vmem:[%s3165_s20 + $0x400] sm:$0xff] }
  0xbc   : > { %837 = vmatprep.subr.mxu0 %v382_v1  ;;  %2458 = vmatprep.subr.mxu1 %v383_v2  ;;  %v421_v0 = vld [vmem:[%s3165_s20 + $0x3e0] sm:$0xff]  ;;  %v422_v1 = vld [vmem:[%s3165_s20 + $0x3e8] sm:$0xff] }
  0xbf   : > { %838 = vmatpush1.xpose.msra.mxu0 %v381_v3  ;;  %2459 = vmatpush3.xpose.msra.mxu1 %v383_v2  ;;  %v420_v2 = vld [vmem:[%s3165_s20 + $0x3d8] sm:$0xff]  ;;  %v418_v3 = vld [vmem:[%s3165_s20 + $0x3c8] sm:$0xff] }
  0xc0   : > { %839 = vmatprep.subr.mxu0 %v379_v4  ;;  %2460 = vmatprep.subr.mxu1 %v380_v5  ;;  %v419_v4 = vld [vmem:[%s3165_s20 + $0x3d0] sm:$0xff] }
  0xc3   : > { %840 = vmatpush1.xpose.msra.mxu0 %v378_v6  ;;  %2461 = vmatpush3.xpose.msra.mxu1 %v380_v5  ;;  %v417_v5 = vld [vmem:[%s3165_s20 + $0x3c0] sm:$0xff]  ;;  %v415_v6 = vld [vmem:[%s3165_s20 + $0x3b0] sm:$0xff] }
  0xc4   : > { %841 = vmatprep.subr.mxu0 %v376_v7  ;;  %2462 = vmatprep.subr.mxu1 %v377_v8  ;;  %v416_v7 = vld [vmem:[%s3165_s20 + $0x3b8] sm:$0xff] }
  0xc7   : > { %842 = vmatpush1.xpose.msra.mxu0 %v375_v9  ;;  %2463 = vmatpush3.xpose.msra.mxu1 %v377_v8  ;;  %v414_v8 = vld [vmem:[%s3165_s20 + $0x3a8] sm:$0xff]  ;;  %v412_v9 = vld [vmem:[%s3165_s20 + $0x398] sm:$0xff] }
  0xc8   : > { %843 = vmatprep.subr.mxu0 %v373_v10  ;;  %2464 = vmatprep.subr.mxu1 %v374_v11  ;;  %v413_v10 = vld [vmem:[%s3165_s20 + $0x3a0] sm:$0xff] }
  0xcb   : > { %844 = vmatpush1.xpose.msra.mxu0 %v372_v12  ;;  %2465 = vmatpush3.xpose.msra.mxu1 %v374_v11  ;;  %v411_v11 = vld [vmem:[%s3165_s20 + $0x390] sm:$0xff]  ;;  %v409_v12 = vld [vmem:[%s3165_s20 + $0x380] sm:$0xff] }
  0xcc   : > { %845 = vmatprep.subr.mxu0 %v370_v13  ;;  %2466 = vmatprep.subr.mxu1 %v371_v14  ;;  %v410_v13 = vld [vmem:[%s3165_s20 + $0x388] sm:$0xff] }
  0xcf   : > { %846 = vmatpush1.xpose.msra.mxu0 %v369_v15  ;;  %2467 = vmatpush3.xpose.msra.mxu1 %v371_v14  ;;  %v408_v14 = vld [vmem:[%s3165_s20 + $0x378] sm:$0xff]  ;;  %v406_v15 = vld [vmem:[%s3165_s20 + $0x368] sm:$0xff] }
  0xd0   : > { %847 = vmatprep.subr.mxu0 %v367_v16  ;;  %2468 = vmatprep.subr.mxu1 %v368_v17  ;;  %v407_v16 = vld [vmem:[%s3165_s20 + $0x370] sm:$0xff] }
  0xd3   : > { %848 = vmatpush1.xpose.msra.mxu0 %v366_v18  ;;  %2469 = vmatpush3.xpose.msra.mxu1 %v368_v17  ;;  %v405_v17 = vld [vmem:[%s3165_s20 + $0x360] sm:$0xff]  ;;  %v403_v18 = vld [vmem:[%s3165_s20 + $0x350] sm:$0xff] }
  0xd4   : > { %849 = vmatprep.subr.mxu0 %v364_v19  ;;  %2470 = vmatprep.subr.mxu1 %v365_v20  ;;  %v404_v19 = vld [vmem:[%s3165_s20 + $0x358] sm:$0xff] }
  0xd7   : > { %850 = vmatpush1.xpose.msra.mxu0 %v363_v21  ;;  %2471 = vmatpush3.xpose.msra.mxu1 %v365_v20  ;;  %v402_v20 = vld [vmem:[%s3165_s20 + $0x348] sm:$0xff]  ;;  %v400_v21 = vld [vmem:[%s3165_s20 + $0x338] sm:$0xff] }
  0xd8   : > { %851 = vmatprep.subr.mxu0 %v361_v22  ;;  %2472 = vmatprep.subr.mxu1 %v362_v23  ;;  %v401_v22 = vld [vmem:[%s3165_s20 + $0x340] sm:$0xff] }
  0xdb   : > { %852 = vmatpush1.xpose.msra.mxu0 %v360_v24  ;;  %2473 = vmatpush3.xpose.msra.mxu1 %v362_v23  ;;  %v399_v23 = vld [vmem:[%s3165_s20 + $0x330] sm:$0xff]  ;;  %v397_v24 = vld [vmem:[%s3165_s20 + $0x320] sm:$0xff] }
  0xdc   : > { %853 = vmatprep.subr.mxu0 %v358_v25  ;;  %2474 = vmatprep.subr.mxu1 %v359_v26  ;;  %v398_v25 = vld [vmem:[%s3165_s20 + $0x328] sm:$0xff] }
  0xdf   : > { %854 = vmatpush1.xpose.msra.mxu0 %v357_v27  ;;  %2475 = vmatpush3.xpose.msra.mxu1 %v359_v26  ;;  %v396_v26 = vld [vmem:[%s3165_s20 + $0x318] sm:$0xff]  ;;  %v394_v27 = vld [vmem:[%s3165_s20 + $0x308] sm:$0xff] }
  0xe0   : > { %855 = vmatprep.subr.mxu0 %v355_v28  ;;  %2476 = vmatprep.subr.mxu1 %v356_v29  ;;  %v395_v28 = vld [vmem:[%s3165_s20 + $0x310] sm:$0xff] }
  0xe3   : > { %856 = vmatpush1.xpose.msra.mxu0 %v354_v30  ;;  %2477 = vmatpush3.xpose.msra.mxu1 %v356_v29  ;;  %v393_v29 = vld [vmem:[%s3165_s20 + $0x300] sm:$0xff]  ;;  %v487_v30 = vld [vmem:[%s3165_s20 + $0x5f0] sm:$0xff] }
  0xe4   : > { %857 = vmatprep.subr.mxu0 %v352_v31  ;;  %2478 = vmatprep.subr.mxu1 %v353_v32  ;;  %v488_v31 = vld [vmem:[%s3165_s20 + $0x5f8] sm:$0xff] }
  0xe7   : > { %858 = vmatpush1.xpose.msra.mxu0 %v351_v33  ;;  %2479 = vmatpush3.xpose.msra.mxu1 %v353_v32  ;;  %v285_v32 = vld [vmem:[%s3155_s26 + $0x60] sm:$0xff]  ;;  %v290_v33 = vld [vmem:[%s3155_s26 + $0x88] sm:$0xff] }
  0xe8   : > { %859 = vmatprep.subr.mxu0 %v349_v34  ;;  %2480 = vmatprep.subr.mxu1 %v350_v35  ;;  %v486_v34 = vld [vmem:[%s3165_s20 + $0x5e8] sm:$0xff] }
  0xeb   : > { %860 = vmatpush1.xpose.msra.mxu0 %v348_v36  ;;  %2481 = vmatpush3.xpose.msra.mxu1 %v350_v35  ;;  %v289_v35 = vld [vmem:[%s3155_s26 + $0x80] sm:$0xff]  ;;  %v484_v36 = vld [vmem:[%s3165_s20 + $0x5d8] sm:$0xff] }
  0xec   : > { %861 = vmatprep.subr.mxu0 %v346_v37  ;;  %2482 = vmatprep.subr.mxu1 %v347_v38  ;;  %v485_v37 = vld [vmem:[%s3165_s20 + $0x5e0] sm:$0xff] }
  0xef   : > { %862 = vmatpush1.xpose.msra.mxu0 %v345_v39  ;;  %2483 = vmatpush3.xpose.msra.mxu1 %v347_v38  ;;  %v293_v38 = vld [vmem:[%s3155_s26 + $0xa0] sm:$0xff]  ;;  %v288_v39 = vld [vmem:[%s3155_s26 + $0x78] sm:$0xff] }
  0xf0   : > { %981 = vmatprep.subr.mxu0 %v439_v40  ;;  %2487 = vmatprep.subr.mxu1 %v440_v41  ;;  %v483_v40 = vld [vmem:[%s3165_s20 + $0x5d0] sm:$0xff] }
  0xf2   : > { %896 = vmatmul.mubr.f32.vlgmr.msra.gmra.mxu0 %v279_v42  ;;  %2485 = vmatmul.mubr.f32.vlgmr.msra.gmra.mxu1 %v284_v43  ;;  %v482_v42 = vld [vmem:[%s3165_s20 + $0x5c8] sm:$0xff]  ;;  %v292_v43 = vld [vmem:[%s3155_s26 + $0x98] sm:$0xff] }
  0xf3   : > { %982 = vmatpush1.xpose.msra.mxu0 %v438_v44  ;;  %2488 = vmatpush3.xpose.msra.mxu1 %v440_v41  ;;  %v481_v41 = vld [vmem:[%s3165_s20 + $0x5c0] sm:$0xff]  ;;  %v480_v44 = vld [vmem:[%s3165_s20 + $0x5b8] sm:$0xff] }
  0xf4   : > { %900 = vmatprep.mubr.f32.mxu0 %v283_v45  ;;  %983 = vmatprep.subr.mxu0 %v436_v46  ;;  %v478_v45 = vld [vmem:[%s3165_s20 + $0x5a8] sm:$0xff]  ;;  %v479_v46 = vld [vmem:[%s3165_s20 + $0x5b0] sm:$0xff] }
  0xf5   : > { %2489 = vmatprep.subr.mxu1 %v437_v47  ;;  %2519 = vmatprep.mubr.f32.mxu1 %v287_v48  ;;  %v475_v48 = vld [vmem:[%s3165_s20 + $0x590] sm:$0xff] }
  0xf6   : > { %901 = vmatmul.mubr.f32.gmra.mxu0 %v282_v49  ;;  %v476_v49 = vld [vmem:[%s3165_s20 + $0x598] sm:$0xff] }
  0xf7   : > { %984 = vmatpush1.xpose.msra.mxu0 %v435_v50  ;;  %2490 = vmatpush3.xpose.msra.mxu1 %v437_v47  ;;  %v477_v47 = vld [vmem:[%s3165_s20 + $0x5a0] sm:$0xff]  ;;  %v474_v50 = vld [vmem:[%s3165_s20 + $0x588] sm:$0xff] }
  0xf8   : > { %985 = vmatprep.subr.mxu0 %v433_v51  ;;  %2491 = vmatprep.subr.mxu1 %v434_v52  ;;  %v472_v51 = vld [vmem:[%s3165_s20 + $0x578] sm:$0xff] }
  0xf9   : > { %1045 = vmatprep.mubr.f32.mxu0 %v286_v53  ;;  %v471_v53 = vld [vmem:[%s3165_s20 + $0x570] sm:$0xff] }
  0xfb   : > { %986 = vmatpush1.xpose.msra.mxu0 %v432_v54  ;;  %2492 = vmatpush3.xpose.msra.mxu1 %v434_v52  ;;  %v473_v52 = vld [vmem:[%s3165_s20 + $0x580] sm:$0xff] }
  0xfc   : > { %987 = vmatprep.subr.mxu0 %v430_v55  ;;  %2493 = vmatprep.subr.mxu1 %v431_v56  ;;  %v469_v54 = vld [vmem:[%s3165_s20 + $0x560] sm:$0xff]  ;;  %v470_v55 = vld [vmem:[%s3165_s20 + $0x568] sm:$0xff] }
  0xff   : > { %988 = vmatpush1.xpose.msra.mxu0 %v429_v57  ;;  %2494 = vmatpush3.xpose.msra.mxu1 %v431_v56  ;;  %v468_v56 = vld [vmem:[%s3165_s20 + $0x558] sm:$0xff]  ;;  %v466_v57 = vld [vmem:[%s3165_s20 + $0x548] sm:$0xff] }
 0x100   : > { %989 = vmatprep.subr.mxu0 %v427_v58  ;;  %2495 = vmatprep.subr.mxu1 %v428_v59  ;;  %v467_v58 = vld [vmem:[%s3165_s20 + $0x550] sm:$0xff] }
 0x103   : > { %990 = vmatpush1.xpose.msra.mxu0 %v426_v60  ;;  %2496 = vmatpush3.xpose.msra.mxu1 %v428_v59  ;;  %v465_v59 = vld [vmem:[%s3165_s20 + $0x540] sm:$0xff]  ;;  %v463_v60 = vld [vmem:[%s3165_s20 + $0x530] sm:$0xff] }
 0x104   : > { %991 = vmatprep.subr.mxu0 %v424_v61  ;;  %2497 = vmatprep.subr.mxu1 %v425_v62  ;;  %v464_v61 = vld [vmem:[%s3165_s20 + $0x538] sm:$0xff] }
 0x107   : > { %992 = vmatpush1.xpose.msra.mxu0 %v423_v63  ;;  %2498 = vmatpush3.xpose.msra.mxu1 %v425_v62  ;;  %v462_v62 = vld [vmem:[%s3165_s20 + $0x528] sm:$0xff]  ;;  %v460_v63 = vld [vmem:[%s3165_s20 + $0x518] sm:$0xff] }
 0x108   : > { %993 = vmatprep.subr.mxu0 %v421_v0  ;;  %2499 = vmatprep.subr.mxu1 %v422_v1  ;;  %v461_v0 = vld [vmem:[%s3165_s20 + $0x520] sm:$0xff] }
 0x10b   : > { %994 = vmatpush1.xpose.msra.mxu0 %v420_v2  ;;  %2500 = vmatpush3.xpose.msra.mxu1 %v422_v1  ;;  %v459_v1 = vld [vmem:[%s3165_s20 + $0x510] sm:$0xff]  ;;  %v457_v2 = vld [vmem:[%s3165_s20 + $0x500] sm:$0xff] }
 0x10c   : > { %995 = vmatprep.subr.mxu0 %v418_v3  ;;  %2501 = vmatprep.subr.mxu1 %v419_v4  ;;  %v458_v3 = vld [vmem:[%s3165_s20 + $0x508] sm:$0xff] }
 0x10f   : > { %996 = vmatpush1.xpose.msra.mxu0 %v417_v5  ;;  %2502 = vmatpush3.xpose.msra.mxu1 %v419_v4  ;;  %v456_v4 = vld [vmem:[%s3165_s20 + $0x4f8] sm:$0xff]  ;;  %v454_v5 = vld [vmem:[%s3165_s20 + $0x4e8] sm:$0xff] }
 0x110   : > { %997 = vmatprep.subr.mxu0 %v415_v6  ;;  %2503 = vmatprep.subr.mxu1 %v416_v7  ;;  %v455_v6 = vld [vmem:[%s3165_s20 + $0x4f0] sm:$0xff] }
 0x113   : > { %998 = vmatpush1.xpose.msra.mxu0 %v414_v8  ;;  %2504 = vmatpush3.xpose.msra.mxu1 %v416_v7  ;;  %v453_v7 = vld [vmem:[%s3165_s20 + $0x4e0] sm:$0xff]  ;;  %v451_v8 = vld [vmem:[%s3165_s20 + $0x4d0] sm:$0xff] }
 0x114   : > { %999 = vmatprep.subr.mxu0 %v412_v9  ;;  %2505 = vmatprep.subr.mxu1 %v413_v10  ;;  %v452_v9 = vld [vmem:[%s3165_s20 + $0x4d8] sm:$0xff] }
 0x117   : > { %1000 = vmatpush1.xpose.msra.mxu0 %v411_v11  ;;  %2506 = vmatpush3.xpose.msra.mxu1 %v413_v10  ;;  %v450_v10 = vld [vmem:[%s3165_s20 + $0x4c8] sm:$0xff]  ;;  %v448_v11 = vld [vmem:[%s3165_s20 + $0x4b8] sm:$0xff] }
 0x118   : > { %1001 = vmatprep.subr.mxu0 %v409_v12  ;;  %2507 = vmatprep.subr.mxu1 %v410_v13  ;;  %v449_v12 = vld [vmem:[%s3165_s20 + $0x4c0] sm:$0xff] }
 0x11b   : > { %1002 = vmatpush1.xpose.msra.mxu0 %v408_v14  ;;  %2508 = vmatpush3.xpose.msra.mxu1 %v410_v13  ;;  %v447_v13 = vld [vmem:[%s3165_s20 + $0x4b0] sm:$0xff]  ;;  %v445_v14 = vld [vmem:[%s3165_s20 + $0x4a0] sm:$0xff] }
 0x11c   : > { %1003 = vmatprep.subr.mxu0 %v406_v15  ;;  %2509 = vmatprep.subr.mxu1 %v407_v16  ;;  %v446_v15 = vld [vmem:[%s3165_s20 + $0x4a8] sm:$0xff] }
 0x11f   : > { %1004 = vmatpush1.xpose.msra.mxu0 %v405_v17  ;;  %2510 = vmatpush3.xpose.msra.mxu1 %v407_v16  ;;  %v444_v16 = vld [vmem:[%s3165_s20 + $0x498] sm:$0xff]  ;;  %v442_v17 = vld [vmem:[%s3165_s20 + $0x488] sm:$0xff] }
 0x120   : > { %1005 = vmatprep.subr.mxu0 %v403_v18  ;;  %2511 = vmatprep.subr.mxu1 %v404_v19  ;;  %v443_v18 = vld [vmem:[%s3165_s20 + $0x490] sm:$0xff] }
 0x123   : > { %1006 = vmatpush1.xpose.msra.mxu0 %v402_v20  ;;  %2512 = vmatpush3.xpose.msra.mxu1 %v404_v19  ;;  %v441_v19 = vld [vmem:[%s3165_s20 + $0x480] sm:$0xff]  ;;  %v1281_v20 = vlaneseq }
 0x124   : > { %1007 = vmatprep.subr.mxu0 %v400_v21  ;;  %2513 = vmatprep.subr.mxu1 %v401_v22  ;;  %v291_v21 = vld [vmem:[%s3155_s26 + $0x90] sm:$0xff] }
 0x127   : > { %1008 = vmatpush1.xpose.msra.mxu0 %v399_v23  ;;  %2514 = vmatpush3.xpose.msra.mxu1 %v401_v22  ;;  %v296_v22 = vld [vmem:[%s3155_s26 + $0xb8] sm:$0xff]  ;;  %v3385_v23 = vand.u32 127, %v1281_v20 }
 0x128   : > { %1009 = vmatprep.subr.mxu0 %v397_v24  ;;  %2515 = vmatprep.subr.mxu1 %v398_v25  ;;  %v295_v24 = vld [vmem:[%s3155_s26 + $0xb0] sm:$0xff] }
 0x129   : > { %vm1283_vm0 = vcmp.lt.s32.totalorder %v3385_v23, 10 }
 0x12b   : > { %1010 = vmatpush1.xpose.msra.mxu0 %v396_v26  ;;  %2516 = vmatpush3.xpose.msra.mxu1 %v398_v25 }
 0x12c   : > { %1011 = vmatprep.subr.mxu0 %v394_v27  ;;  %2517 = vmatprep.subr.mxu1 %v395_v28  ;;  %v294_v27 = vld [vmem:[%s3155_s26 + $0xa8] sm:$0xff] }
 0x12f   : > { %1012 = vmatpush1.xpose.msra.mxu0 %v393_v29  ;;  %2518 = vmatpush3.xpose.msra.mxu1 %v395_v28 }
 0x130   : > { %1131 = vmatprep.subr.mxu0 %v487_v30  ;;  %2522 = vmatprep.subr.mxu1 %v488_v31 }
 0x132   : > { %1046 = vmatmul.mubr.f32.vlgmr.msra.gmra.mxu0 %v285_v32  ;;  %2520 = vmatmul.mubr.f32.vlgmr.msra.gmra.mxu1 %v290_v33 }
 0x133   : > { %1132 = vmatpush1.xpose.msra.mxu0 %v486_v34  ;;  %2523 = vmatpush3.xpose.msra.mxu1 %v488_v31 }
 0x134   : > { %1050 = vmatprep.mubr.f32.mxu0 %v289_v35  ;;  %1133 = vmatprep.subr.mxu0 %v484_v36 }
 0x135   : > { %2524 = vmatprep.subr.mxu1 %v485_v37  ;;  %2554 = vmatprep.mubr.f32.mxu1 %v293_v38 }
 0x136   : > { %1051 = vmatmul.mubr.f32.gmra.mxu0 %v288_v39 }
 0x137   : > { %1134 = vmatpush1.xpose.msra.mxu0 %v483_v40  ;;  %2525 = vmatpush3.xpose.msra.mxu1 %v485_v37 }
 0x138   : > { %1135 = vmatprep.subr.mxu0 %v481_v41  ;;  %2526 = vmatprep.subr.mxu1 %v482_v42 }
 0x139   : > { %1195 = vmatprep.mubr.f32.mxu0 %v292_v43 }
 0x13b   : > { %1136 = vmatpush1.xpose.msra.mxu0 %v480_v44  ;;  %2527 = vmatpush3.xpose.msra.mxu1 %v482_v42 }
 0x13c   : > { %1137 = vmatprep.subr.mxu0 %v478_v45  ;;  %2528 = vmatprep.subr.mxu1 %v479_v46 }
 0x13f   : > { %1138 = vmatpush1.xpose.msra.mxu0 %v477_v47  ;;  %2529 = vmatpush3.xpose.msra.mxu1 %v479_v46 }
 0x140   : > { %1139 = vmatprep.subr.mxu0 %v475_v48  ;;  %2530 = vmatprep.subr.mxu1 %v476_v49 }
 0x143   : > { %1140 = vmatpush1.xpose.msra.mxu0 %v474_v50  ;;  %2531 = vmatpush3.xpose.msra.mxu1 %v476_v49 }
 0x144   : > { %1141 = vmatprep.subr.mxu0 %v472_v51  ;;  %2532 = vmatprep.subr.mxu1 %v473_v52 }
 0x147   : > { %1142 = vmatpush1.xpose.msra.mxu0 %v471_v53  ;;  %2533 = vmatpush3.xpose.msra.mxu1 %v473_v52 }
 0x148   : > { %1143 = vmatprep.subr.mxu0 %v469_v54  ;;  %2534 = vmatprep.subr.mxu1 %v470_v55 }
 0x14b   : > { %1144 = vmatpush1.xpose.msra.mxu0 %v468_v56  ;;  %2535 = vmatpush3.xpose.msra.mxu1 %v470_v55 }
 0x14c   : > { %1145 = vmatprep.subr.mxu0 %v466_v57  ;;  %2536 = vmatprep.subr.mxu1 %v467_v58 }
 0x14f   : > { %1146 = vmatpush1.xpose.msra.mxu0 %v465_v59  ;;  %2537 = vmatpush3.xpose.msra.mxu1 %v467_v58 }
 0x150   : > { %1147 = vmatprep.subr.mxu0 %v463_v60  ;;  %2538 = vmatprep.subr.mxu1 %v464_v61 }
 0x153   : > { %1148 = vmatpush1.xpose.msra.mxu0 %v462_v62  ;;  %2539 = vmatpush3.xpose.msra.mxu1 %v464_v61 }
 0x154   : > { %1149 = vmatprep.subr.mxu0 %v460_v63  ;;  %2540 = vmatprep.subr.mxu1 %v461_v0 }
 0x157   : > { %1150 = vmatpush1.xpose.msra.mxu0 %v459_v1  ;;  %2541 = vmatpush3.xpose.msra.mxu1 %v461_v0 }
 0x158   : > { %1151 = vmatprep.subr.mxu0 %v457_v2  ;;  %2542 = vmatprep.subr.mxu1 %v458_v3 }
 0x15b   : > { %1152 = vmatpush1.xpose.msra.mxu0 %v456_v4  ;;  %2543 = vmatpush3.xpose.msra.mxu1 %v458_v3 }
 0x15c   : > { %1153 = vmatprep.subr.mxu0 %v454_v5  ;;  %2544 = vmatprep.subr.mxu1 %v455_v6 }
 0x15f   : > { %1154 = vmatpush1.xpose.msra.mxu0 %v453_v7  ;;  %2545 = vmatpush3.xpose.msra.mxu1 %v455_v6 }
 0x160   : > { %1155 = vmatprep.subr.mxu0 %v451_v8  ;;  %2546 = vmatprep.subr.mxu1 %v452_v9 }
 0x163   : > { %1156 = vmatpush1.xpose.msra.mxu0 %v450_v10  ;;  %2547 = vmatpush3.xpose.msra.mxu1 %v452_v9 }
 0x164   : > { %1157 = vmatprep.subr.mxu0 %v448_v11  ;;  %2548 = vmatprep.subr.mxu1 %v449_v12 }
 0x167   : > { %1158 = vmatpush1.xpose.msra.mxu0 %v447_v13  ;;  %2549 = vmatpush3.xpose.msra.mxu1 %v449_v12 }
 0x168   : > { %1159 = vmatprep.subr.mxu0 %v445_v14  ;;  %2550 = vmatprep.subr.mxu1 %v446_v15 }
 0x16b   : > { %1160 = vmatpush1.xpose.msra.mxu0 %v444_v16  ;;  %2551 = vmatpush3.xpose.msra.mxu1 %v446_v15 }
 0x16c   : > { %1161 = vmatprep.subr.mxu0 %v442_v17  ;;  %2552 = vmatprep.subr.mxu1 %v443_v18 }
 0x16f   : > { %1162 = vmatpush1.xpose.msra.mxu0 %v441_v19  ;;  %2553 = vmatpush3.xpose.msra.mxu1 %v443_v18 }
 0x172   : > { %v747_v25 = vpop.f32.mrf.mxu0  ;;  %v2451_v26 = vpop.f32.mrf.mxu1  ;;  %1196 = vmatmul.mubr.f32.vlgmr.msra.gmra.mxu0 %v291_v21  ;;  %2555 = vmatmul.mubr.f32.vlgmr.msra.gmra.mxu1 %v296_v22 }
 0x173   : > { %1200 = vmatprep.mubr.f32.mxu0 %v295_v24 }
 0x174   : > { %v749_v28 = vpop.f32.mrf.mxu0  ;;  %v822_v29 = vpop.f32.mrf.mxu1 }
 0x175   : > { %v823_v30 = vadd.f32 %v822_v29, %v747_v25  ;;  %v534_v28 = vld [vmem:[%s3456_s22 + $0x168] sm:$0xff]  ;;  %v536_v29 = vld [vmem:[%s3456_s22 + $0x178] sm:$0xff] }
 0x176   : > { %v752_v31 = vpop.f32.mrf.mxu0  ;;  %1201 = vmatmul.mubr.f32.gmra.mxu0 %v294_v27  ;;  %v535_v27 = vld [vmem:[%s3456_s22 + $0x170] sm:$0xff]  ;;  %2557 = vmatprep.subr.mxu1 %v536_v29 }
 0x177   : > { %v3392_v32 = vsel %vm1283_vm0, %v823_v30, -inf  ;;  %v828_v33 = vadd.f32 %v2451_v26, %v752_v31  ;;  %1492 = vmatprep.subr.mxu0 %v535_v27  ;;  %v532_v30 = vld [vmem:[%s3456_s22 + $0x158] sm:$0xff]  ;;  %2558 = vmatpush3.msra.mxu1 %v536_v29  ;;  %v531_v31 = vld [vmem:[%s3456_s22 + $0x150] sm:$0xff] }
 0x178   : > { %vm1292_vm1 = vcmp.lt.f32.partialorder %v3392_v32, inf  ;;  %v754_v34 = vpop.f32.mrf.mxu0  ;;  %1493 = vmatpush1.msra.mxu0 %v534_v28  ;;  %v491_v27 = vld [vmem:[%s3456_s22 + $0x10] sm:$0xff]  ;;  %v2942_v28 = vmov 0.0  }
 0x179   : > { %v3397_v35 = vsel %vm1283_vm0, %v828_v33, -inf  ;;  %v1300_v36 = vsel %vm1292_vm1, %v3392_v32, -inf  ;;  %1494 = vmatprep.subr.mxu0 %v532_v30  ;;  %v533_v33 = vld [vmem:[%s3456_s22 + $0x160] sm:$0xff]  ;;  %1556 = vmatprep.mubr.f32.mxu0 %v2942_v28  ;;  %v583_v29 = vld [vmem:[%s3456_s22 + $0x2f0] sm:$0xff]  ;;  %v584_v30 = vld [vmem:[%s3456_s22 + $0x2f8] sm:$0xff] }
 0x17a   : > { %1308 = vmax.xlane.f32.xlu0 %v1300_v36  ;;  %vm1293_vm2 = vcmp.lt.f32.partialorder %v3397_v35, inf  ;;  %1495 = vmatpush1.msra.mxu0 %v531_v31  ;;  %v529_v34 = vld [vmem:[%s3456_s22 + $0x140] sm:$0xff]  ;;  %v528_v36 = vld [vmem:[%s3456_s22 + $0x138] sm:$0xff] }
 0x17b   : > { %v1301_v37 = vsel %vm1293_vm2, %v3397_v35, -inf  ;;  %2559 = vmatprep.subr.mxu1 %v533_v33  ;;  %1496 = vmatprep.subr.mxu0 %v529_v34 }
 0x17c   : > { %2560 = vmatpush3.msra.mxu1 %v533_v33  ;;  %1497 = vmatpush1.msra.mxu0 %v528_v36 }
 0x17e   : > { %1310 = vmax.xlane.f32.xlu0 %v1301_v37  ;;  %v530_v37 = vld [vmem:[%s3456_s22 + $0x148] sm:$0xff] }
 0x17f   : > { %2561 = vmatprep.subr.mxu1 %v530_v37 }
 0x180   : > { %2562 = vmatpush3.msra.mxu1 %v530_v37 }
 0x1b2   : > { %v897_v38 = vpop.f32.mrf.mxu0  ;;  %v2486_v39 = vpop.f32.mrf.mxu1 }
 0x1b4   : > { %v899_v40 = vpop.f32.mrf.mxu0  ;;  %v972_v41 = vpop.f32.mrf.mxu1 }
 0x1b5   : > { %v973_v42 = vadd.f32 %v972_v41, %v897_v38  ;;  %v526_v38 = vld [vmem:[%s3456_s22 + $0x128] sm:$0xff]  ;;  %v527_v40 = vld [vmem:[%s3456_s22 + $0x130] sm:$0xff] }
 0x1b6   : > { %v902_v43 = vpop.f32.mrf.mxu0  ;;  %1498 = vmatprep.subr.mxu0 %v526_v38  ;;  %2563 = vmatprep.subr.mxu1 %v527_v40  ;;  %v523_v41 = vld [vmem:[%s3456_s22 + $0x110] sm:$0xff] }
 0x1b7   : > { %v3404_v44 = vsel %vm1283_vm0, %v973_v42, -inf  ;;  %v978_v45 = vadd.f32 %v2486_v39, %v902_v43  ;;  %v525_v39 = vld [vmem:[%s3456_s22 + $0x120] sm:$0xff]  ;;  %2564 = vmatpush3.msra.mxu1 %v527_v40  ;;  %v522_v42 = vld [vmem:[%s3456_s22 + $0x108] sm:$0xff]  ;;  %v524_v43 = vld [vmem:[%s3456_s22 + $0x118] sm:$0xff] }
 0x1b8   : > { %vm1294_vm3 = vcmp.lt.f32.partialorder %v3404_v44, inf  ;;  %v904_v46 = vpop.f32.mrf.mxu0  ;;  %1499 = vmatpush1.msra.mxu0 %v525_v39  ;;  %2565 = vmatprep.subr.mxu1 %v524_v43 }
 0x1b9   : > { %v3409_v47 = vsel %vm1283_vm0, %v978_v45, -inf  ;;  %v1302_v48 = vsel %vm1294_vm3, %v3404_v44, -inf  ;;  %1500 = vmatprep.subr.mxu0 %v523_v41  ;;  %v520_v45 = vld [vmem:[%s3456_s22 + $0xf8] sm:$0xff]  ;;  %2566 = vmatpush3.msra.mxu1 %v524_v43  ;;  %v519_v46 = vld [vmem:[%s3456_s22 + $0xf0] sm:$0xff] }
 0x1ba   : > { %1312 = vmax.xlane.f32.xlu1 %v1302_v48  ;;  %vm1295_vm4 = vcmp.lt.f32.partialorder %v3409_v47, inf  ;;  %1501 = vmatpush1.msra.mxu0 %v522_v42  ;;  %v521_v48 = vld [vmem:[%s3456_s22 + $0x100] sm:$0xff] }
 0x1bb   : > { %v1303_v49 = vsel %vm1295_vm4, %v3409_v47, -inf  ;;  %1502 = vmatprep.subr.mxu0 %v520_v45  ;;  %2567 = vmatprep.subr.mxu1 %v521_v48 }
 0x1bc   : > { %1503 = vmatpush1.msra.mxu0 %v519_v46  ;;  %2568 = vmatpush3.msra.mxu1 %v521_v48 }
 0x1be   : > { %1314 = vmax.xlane.f32.xlu1 %v1303_v49  ;;  %v517_v49 = vld [vmem:[%s3456_s22 + $0xe0] sm:$0xff] }
 0x1bf   : > { %1504 = vmatprep.subr.mxu0 %v517_v49 }
 0x1f2   : > { %v1047_v50 = vpop.f32.mrf.mxu0  ;;  %v2521_v51 = vpop.f32.mrf.mxu1 }
 0x1f4   : > { %v1049_v52 = vpop.f32.mrf.mxu0  ;;  %v1122_v53 = vpop.f32.mrf.mxu1 }
 0x1f5   : > { %v1123_v54 = vadd.f32 %v1122_v53, %v1047_v50  ;;  %v518_v52 = vld [vmem:[%s3456_s22 + $0xe8] sm:$0xff] }
 0x1f6   : > { %v1052_v55 = vpop.f32.mrf.mxu0  ;;  %2569 = vmatprep.subr.mxu1 %v518_v52  ;;  %v514_v53 = vld [vmem:[%s3456_s22 + $0xc8] sm:$0xff] }
 0x1f7   : > { %v3416_v56 = vsel %vm1283_vm0, %v1123_v54, -inf  ;;  %v1128_v57 = vadd.f32 %v2521_v51, %v1052_v55  ;;  %v516_v51 = vld [vmem:[%s3456_s22 + $0xd8] sm:$0xff]  ;;  %2570 = vmatpush3.msra.mxu1 %v518_v52 }
 0x1f8   : > { %vm1296_vm5 = vcmp.lt.f32.partialorder %v3416_v56, inf  ;;  %v1054_v58 = vpop.f32.mrf.mxu0  ;;  %1505 = vmatpush1.msra.mxu0 %v516_v51 }
 0x1f9   : > { %v3421_v59 = vsel %vm1283_vm0, %v1128_v57, -inf  ;;  %v1304_v60 = vsel %vm1296_vm5, %v3416_v56, -inf  ;;  %1506 = vmatprep.subr.mxu0 %v514_v53  ;;  %v513_v57 = vld [vmem:[%s3456_s22 + $0xc0] sm:$0xff]  ;;  %v515_v58 = vld [vmem:[%s3456_s22 + $0xd0] sm:$0xff] }
 0x1fa   : > { %1316 = vmax.xlane.f32.xlu0 %v1304_v60  ;;  %vm1297_vm6 = vcmp.lt.f32.partialorder %v3421_v59, inf  ;;  %1507 = vmatpush1.msra.mxu0 %v513_v57  ;;  %v511_v60 = vld [vmem:[%s3456_s22 + $0xb0] sm:$0xff] }
 0x1fb   : > { %v1305_v61 = vsel %vm1297_vm6, %v3421_v59, -inf  ;;  %2571 = vmatprep.subr.mxu1 %v515_v58  ;;  %1508 = vmatprep.subr.mxu0 %v511_v60 }
 0x1fc   : > { %1318 = vmax.xlane.f32.xlu1 %v1305_v61  ;;  %2572 = vmatpush3.msra.mxu1 %v515_v58 }
 0x203   : > { %v1309_v62 = vpop.xlane.xlu0 %1308 }
 0x204   : > { %vm1324_vm7 = vcmp.lt.f32.partialorder %v3392_v32, %v1309_v62  ;;  %v510_v62 = vld [vmem:[%s3456_s22 + $0xa8] sm:$0xff] }
 0x205   : > { %v1332_v63 = vsel %vm1324_vm7, %v3392_v32, -inf  ;;  %1509 = vmatpush1.msra.mxu0 %v510_v62 }
 0x206   : > { %1340 = vmax.xlane.f32.xlu0 %v1332_v63  ;;  %v512_v63 = vld [vmem:[%s3456_s22 + $0xb8] sm:$0xff] }
 0x207   : > { %v1311_v0 = vpop.xlane.xlu0 %1310  ;;  %2573 = vmatprep.subr.mxu1 %v512_v63 }
 0x208   : > { %vm1325_vm8 = vcmp.lt.f32.partialorder %v3397_v35, %v1311_v0  ;;  %v508_v0 = vld [vmem:[%s3456_s22 + $0x98] sm:$0xff]  ;;  %2574 = vmatpush3.msra.mxu1 %v512_v63 }
 0x209   : > { %v1333_v1 = vsel %vm1325_vm8, %v3397_v35, -inf  ;;  %1510 = vmatprep.subr.mxu0 %v508_v0 }
 0x20a   : > { %1342 = vmax.xlane.f32.xlu1 %v1333_v1  ;;  %v507_v1 = vld [vmem:[%s3456_s22 + $0x90] sm:$0xff] }
 0x20b   : > { %1511 = vmatpush1.msra.mxu0 %v507_v1  ;;  %v582_v1 = vld [vmem:[%s3456_s22 + $0x2e8] sm:$0xff] }
 0x232   : > { %v1197_v2 = vpop.f32.mrf.mxu0  ;;  %v2556_v3 = vpop.f32.mrf.mxu1 }
 0x234   : > { %v1199_v4 = vpop.f32.mrf.mxu0  ;;  %v1272_v5 = vpop.f32.mrf.mxu1 }
 0x235   : > { %v1273_v6 = vadd.f32 %v1272_v5, %v1197_v2  ;;  %v509_v2 = vld [vmem:[%s3456_s22 + $0xa0] sm:$0xff]  ;;  %v504_v4 = vld [vmem:[%s3456_s22 + $0x78] sm:$0xff]  ;;  %v506_v5 = vld [vmem:[%s3456_s22 + $0x88] sm:$0xff] }
 0x236   : > { %v1202_v7 = vpop.f32.mrf.mxu0  ;;  %2575 = vmatprep.subr.mxu1 %v509_v2 }
 0x237   : > { %v3432_v8 = vsel %vm1283_vm0, %v1273_v6, -inf  ;;  %v1278_v9 = vadd.f32 %v2556_v3, %v1202_v7  ;;  %v505_v3 = vld [vmem:[%s3456_s22 + $0x80] sm:$0xff]  ;;  %2576 = vmatpush3.msra.mxu1 %v509_v2  ;;  %v502_v6 = vld [vmem:[%s3456_s22 + $0x68] sm:$0xff]  ;;  %v580_v2 = vld [vmem:[%s3456_s22 + $0x2d8] sm:$0xff] }
 0x238   : > { %v1204_v10 = vpop.f32.mrf.mxu0  ;;  %vm1298_vm9 = vcmp.lt.f32.partialorder %v3432_v8, inf  ;;  %1512 = vmatprep.subr.mxu0 %v505_v3  ;;  %2577 = vmatprep.subr.mxu1 %v506_v5  ;;  %v501_v7 = vld [vmem:[%s3456_s22 + $0x60] sm:$0xff] }
 0x239   : > { %v3437_v11 = vsel %vm1283_vm0, %v1278_v9, -inf  ;;  %v1306_v12 = vsel %vm1298_vm9, %v3432_v8, -inf  ;;  %1513 = vmatpush1.msra.mxu0 %v504_v4  ;;  %v503_v9 = vld [vmem:[%s3456_s22 + $0x70] sm:$0xff]  ;;  %2578 = vmatpush3.msra.mxu1 %v506_v5  ;;  %v581_v3 = vld [vmem:[%s3456_s22 + $0x2e0] sm:$0xff]  ;;  %v578_v5 = vld [vmem:[%s3456_s22 + $0x2c8] sm:$0xff] }
 0x23a   : > { %1320 = vmax.xlane.f32.xlu0 %v1306_v12  ;;  %vm1299_vm10 = vcmp.lt.f32.partialorder %v3437_v11, inf  ;;  %1514 = vmatprep.subr.mxu0 %v502_v6  ;;  %v499_v10 = vld [vmem:[%s3456_s22 + $0x50] sm:$0xff]  ;;  %v577_v6 = vld [vmem:[%s3456_s22 + $0x2c0] sm:$0xff] }
 0x23b   : > { %v1307_v13 = vsel %vm1299_vm10, %v3437_v11, -inf  ;;  %1515 = vmatpush1.msra.mxu0 %v501_v7  ;;  %2579 = vmatprep.subr.mxu1 %v503_v9  ;;  %v579_v4 = vld [vmem:[%s3456_s22 + $0x2d0] sm:$0xff] }
 0x23c   : > { %1322 = vmax.xlane.f32.xlu1 %v1307_v13  ;;  %v498_v13 = vld [vmem:[%s3456_s22 + $0x48] sm:$0xff]  ;;  %1516 = vmatprep.subr.mxu0 %v499_v10  ;;  %v575_v10 = vld [vmem:[%s3456_s22 + $0x2b0] sm:$0xff] }
 0x23d   : > { %2580 = vmatpush3.msra.mxu1 %v503_v9  ;;  %1517 = vmatpush1.msra.mxu0 %v498_v13  ;;  %v576_v9 = vld [vmem:[%s3456_s22 + $0x2b8] sm:$0xff]  ;;  %v573_v13 = vld [vmem:[%s3456_s22 + $0x2a0] sm:$0xff] }
 0x243   : > { %v1313_v14 = vpop.xlane.xlu1 %1312 }
 0x244   : > { %vm1326_vm11 = vcmp.lt.f32.partialorder %v3404_v44, %v1313_v14  ;;  %v500_v14 = vld [vmem:[%s3456_s22 + $0x58] sm:$0xff] }
 0x245   : > { %v1334_v15 = vsel %vm1326_vm11, %v3404_v44, -inf  ;;  %2581 = vmatprep.subr.mxu1 %v500_v14 }
 0x246   : > { %1344 = vmax.xlane.f32.xlu0 %v1334_v15  ;;  %v496_v15 = vld [vmem:[%s3456_s22 + $0x38] sm:$0xff]  ;;  %2582 = vmatpush3.msra.mxu1 %v500_v14 }
 0x247   : > { %v1315_v16 = vpop.xlane.xlu1 %1314  ;;  %1518 = vmatprep.subr.mxu0 %v496_v15  ;;  %v572_v14 = vld [vmem:[%s3456_s22 + $0x298] sm:$0xff]  ;;  %v571_v15 = vld [vmem:[%s3456_s22 + $0x290] sm:$0xff] }
 0x248   : > { %vm1327_vm12 = vcmp.lt.f32.partialorder %v3409_v47, %v1315_v16 }
 0x249   : > { %v1335_v17 = vsel %vm1327_vm12, %v3409_v47, -inf }
 0x24a   : > { %1346 = vmax.xlane.f32.xlu1 %v1335_v17  ;;  %v495_v17 = vld [vmem:[%s3456_s22 + $0x30] sm:$0xff] }
 0x24b   : > { %1519 = vmatpush1.msra.mxu0 %v495_v17  ;;  %v570_v17 = vld [vmem:[%s3456_s22 + $0x288] sm:$0xff] }
 0x283   : > { %v1317_v18 = vpop.xlane.xlu0 %1316 }
 0x284   : > { %vm1328_vm13 = vcmp.lt.f32.partialorder %v3416_v56, %v1317_v18  ;;  %v497_v18 = vld [vmem:[%s3456_s22 + $0x40] sm:$0xff] }
 0x285   : > { %v1319_v19 = vpop.xlane.xlu1 %1318  ;;  %v1336_v20 = vsel %vm1328_vm13, %v3416_v56, -inf  ;;  %2583 = vmatprep.subr.mxu1 %v497_v18 }
 0x286   : > { %vm1329_vm14 = vcmp.lt.f32.partialorder %v3421_v59, %v1319_v19  ;;  %1348 = vmax.xlane.f32.xlu0 %v1336_v20  ;;  %v493_v19 = vld [vmem:[%s3456_s22 + $0x20] sm:$0xff]  ;;  %2584 = vmatpush3.msra.mxu1 %v497_v18 }
 0x287   : > { %v1337_v21 = vsel %vm1329_vm14, %v3421_v59, -inf  ;;  %1520 = vmatprep.subr.mxu0 %v493_v19  ;;  %v569_v18 = vld [vmem:[%s3456_s22 + $0x280] sm:$0xff] }
 0x288   : > { %1350 = vmax.xlane.f32.xlu1 %v1337_v21  ;;  %v492_v21 = vld [vmem:[%s3456_s22 + $0x18] sm:$0xff] }
 0x289   : > { %1521 = vmatpush1.msra.mxu0 %v492_v21  ;;  %v567_v21 = vld [vmem:[%s3456_s22 + $0x270] sm:$0xff] }
 0x28f   : > { %v1341_v22 = vpop.xlane.xlu0 %1340 }
 0x290   : > { %vm1356_vm15 = vcmp.lt.f32.partialorder %v3392_v32, %v1341_v22  ;;  %v494_v22 = vld [vmem:[%s3456_s22 + $0x28] sm:$0xff] }
 0x291   : > { %v1364_v24 = vsel %vm1356_vm15, %v3392_v32, -inf  ;;  %2585 = vmatprep.subr.mxu1 %v494_v22 }
 0x292   : > { %1372 = vmax.xlane.f32.xlu0 %v1364_v24  ;;  %v490_v24 = vld [vmem:[%s3456_s22 + $0x8] sm:$0xff]  ;;  %2586 = vmatpush3.msra.mxu1 %v494_v22 }
 0x293   : > { %v1343_v25 = vpop.xlane.xlu1 %1342  ;;  %1522 = vmatprep.subr.mxu0 %v490_v24  ;;  %2587 = vmatprep.subr.mxu1 %v491_v27  ;;  %v566_v22 = vld [vmem:[%s3456_s22 + $0x268] sm:$0xff] }
 0x294   : > { %vm1357_vm1 = vcmp.lt.f32.partialorder %v3397_v35, %v1343_v25  ;;  %2588 = vmatpush3.msra.mxu1 %v491_v27  ;;  %v564_v27 = vld [vmem:[%s3456_s22 + $0x258] sm:$0xff] }
 0x295   : > { %v1365_v26 = vsel %vm1357_vm1, %v3397_v35, -inf  ;;  %2592 = vmatprep.subr.mxu1 %v584_v30 }
 0x296   : > { %1374 = vmax.xlane.f32.xlu1 %v1365_v26  ;;  %v489_v26 = vld [vmem:[%s3456_s22] sm:$0xff] }
 0x297   : > { %1523 = vmatpush1.msra.mxu0 %v489_v26 }
 0x298   : > { %1644 = vmatprep.subr.mxu0 %v583_v29  ;;  %v563_v29 = vld [vmem:[%s3456_s22 + $0x250] sm:$0xff] }
 0x2c3   : > { %v1321_v50 = vpop.xlane.xlu0 %1320 }
 0x2c4   : > { %vm1330_vm2 = vcmp.lt.f32.partialorder %v3432_v8, %v1321_v50 }
 0x2c5   : > { %v1323_v54 = vpop.xlane.xlu1 %1322  ;;  %v1338_v55 = vsel %vm1330_vm2, %v3432_v8, -inf }
 0x2c6   : > { %vm1331_vm3 = vcmp.lt.f32.partialorder %v3437_v11, %v1323_v54  ;;  %1352 = vmax.xlane.f32.xlu0 %v1338_v55 }
 0x2c7   : > { %v1339_v61 = vsel %vm1331_vm3, %v3437_v11, -inf }
 0x2c8   : > { %1354 = vmax.xlane.f32.xlu1 %v1339_v61 }
 0x2cf   : > { %v1345_v12 = vpop.xlane.xlu0 %1344 }
 0x2d0   : > { %vm1358_vm4 = vcmp.lt.f32.partialorder %v3404_v44, %v1345_v12  ;;  %v574_v12 = vld [vmem:[%s3456_s22 + $0x2a8] sm:$0xff] }
 0x2d1   : > { %v1366_v16 = vsel %vm1358_vm4, %v3404_v44, -inf }
 0x2d2   : > { %1376 = vmax.xlane.f32.xlu0 %v1366_v16 }
 0x2d3   : > { %v1347_v20 = vpop.xlane.xlu1 %1346 }
 0x2d4   : > { %vm1359_vm5 = vcmp.lt.f32.partialorder %v3409_v47, %v1347_v20  ;;  %v568_v20 = vld [vmem:[%s3456_s22 + $0x278] sm:$0xff] }
 0x2d5   : > { %v1367_v25 = vsel %vm1359_vm5, %v3409_v47, -inf }
 0x2d6   : > { %1378 = vmax.xlane.f32.xlu1 %v1367_v25 }
 0x30f   : > { %v1349_v31 = vpop.xlane.xlu0 %1348 }
 0x310   : > { %vm1360_vm6 = vcmp.lt.f32.partialorder %v3416_v56, %v1349_v31  ;;  %v561_v31 = vld [vmem:[%s3456_s22 + $0x240] sm:$0xff] }
 0x311   : > { %v1351_v33 = vpop.xlane.xlu1 %1350  ;;  %v1368_v34 = vsel %vm1360_vm6, %v3416_v56, -inf }
 0x312   : > { %vm1361_vm7 = vcmp.lt.f32.partialorder %v3421_v59, %v1351_v33  ;;  %1380 = vmax.xlane.f32.xlu0 %v1368_v34  ;;  %v560_v33 = vld [vmem:[%s3456_s22 + $0x238] sm:$0xff]  ;;  %v559_v34 = vld [vmem:[%s3456_s22 + $0x230] sm:$0xff] }
 0x313   : > { %v1369_v36 = vsel %vm1361_vm7, %v3421_v59, -inf }
 0x314   : > { %1382 = vmax.xlane.f32.xlu1 %v1369_v36 }
 0x31b   : > { %v1373_v37 = vpop.xlane.xlu0 %1372 }
 0x31c   : > { %vm1388_vm8 = vcmp.ge.f32.partialorder %v3392_v32, %v1373_v37  ;;  %v558_v37 = vld [vmem:[%s3456_s22 + $0x228] sm:$0xff] }
 0x31d   : > { %vm1396_vm9 = vmand %vm1388_vm8, %vm1283_vm0 }
 0x31e   : > { %v1404_v39 = vsel %vm1396_vm9, %v3392_v32, 0.0 }
 0x31f   : > { %v1375_v38 = vpop.xlane.xlu1 %1374  ;;  %v1412_v41 = vmul.f32 %v1404_v39, %v1404_v39 }
 0x320   : > { %vm1389_vm10 = vcmp.ge.f32.partialorder %v3397_v35, %v1375_v38  ;;  %v557_v38 = vld [vmem:[%s3456_s22 + $0x220] sm:$0xff] }
 0x321   : > { %vm1397_vm11 = vmand %vm1389_vm10, %vm1283_vm0 }
 0x322   : > { %v1405_v40 = vsel %vm1397_vm11, %v3397_v35, 0.0 }
 0x323   : > { %v1413_v42 = vmul.f32 %v1405_v40, %v1405_v40 }
 0x325   : > { %v1420_v43 = vadd.f32 %v1413_v42, %v1412_v41  ;;  %v555_v41 = vld [vmem:[%s3456_s22 + $0x210] sm:$0xff]  ;;  %v554_v42 = vld [vmem:[%s3456_s22 + $0x208] sm:$0xff] }
 0x327   : > { %v1421_v45 = vrot.slane %v1420_v43, 4 }
 0x329   : > { %v1422_v46 = vadd.f32 %v1421_v45, %v1420_v43  ;;  %v553_v43 = vld [vmem:[%s3456_s22 + $0x200] sm:$0xff] }
 0x32b   : > { %v1423_v48 = vrot.slane %v1422_v46, 2 }
 0x32d   : > { %v1424_v49 = vadd.f32 %v1423_v48, %v1422_v46  ;;  %v552_v46 = vld [vmem:[%s3456_s22 + $0x1f8] sm:$0xff]  ;;  %v551_v48 = vld [vmem:[%s3456_s22 + $0x1f0] sm:$0xff] }
 0x32f   : > { %v1425_v50 = vrot.slane %v1424_v49, 1 }
 0x331   : > { %v1426_v51 = vadd.f32 %v1425_v50, %v1424_v49  ;;  %v550_v49 = vld [vmem:[%s3456_s22 + $0x1e8] sm:$0xff] }
 0x333   : > { %2767 = vrsqrt.f32 %v1426_v51  ;;  %vm1450_vm12 = vcmp.eq.f32.partialorder %v1426_v51, inf  ;;  %v1453_v32 = vand.u32 2147483648, %v1426_v51  ;;  %vm1452_vm13 = vcmp.eq.f32.partialorder %v1426_v51, 0.0 }
 0x340   : > { %v2768_v52 = vpop.eup %2767 }
 0x341   : > { %v1449_v53 = vmul.f32 %v2768_v52, %v1426_v51  ;;  %v548_v52 = vld [vmem:[%s3456_s22 + $0x1d8] sm:$0xff] }
 0x343   : > { %v1451_v54 = vsel %vm1450_vm12, %v1426_v51, %v1449_v53  ;;  %v549_v51 = vld [vmem:[%s3456_s22 + $0x1e0] sm:$0xff]  ;;  %v547_v53 = vld [vmem:[%s3456_s22 + $0x1d0] sm:$0xff] }
 0x344   : > { %v1454_v55 = vsel %vm1452_vm13, %v1453_v32, %v1451_v54  ;;  %v546_v54 = vld [vmem:[%s3456_s22 + $0x1c8] sm:$0xff] }
 0x345   : > { %v1476_v57 = vmax.f32 %v1454_v55, 1e-12  ;;  %v545_v55 = vld [vmem:[%s3456_s22 + $0x1c0] sm:$0xff] }
 0x347   : > { %2769 = vrcp.f32 %v1476_v57  ;;  %v544_v57 = vld [vmem:[%s3456_s22 + $0x1b8] sm:$0xff] }
 0x34f   : > { %v1353_v35 = vpop.xlane.xlu0 %1352 }
 0x350   : > { %vm1362_vm14 = vcmp.lt.f32.partialorder %v3432_v8, %v1353_v35 }
 0x351   : > { %v1355_v58 = vpop.xlane.xlu1 %1354  ;;  %v1370_v60 = vsel %vm1362_vm14, %v3432_v8, -inf }
 0x352   : > { %vm1363_vm15 = vcmp.lt.f32.partialorder %v3437_v11, %v1355_v58  ;;  %1384 = vmax.xlane.f32.xlu0 %v1370_v60  ;;  %v543_v58 = vld [vmem:[%s3456_s22 + $0x1b0] sm:$0xff]  ;;  %v542_v60 = vld [vmem:[%s3456_s22 + $0x1a8] sm:$0xff] }
 0x353   : > { %v1371_v61 = vsel %vm1363_vm15, %v3437_v11, -inf }
 0x354   : > { %v2770_v62 = vpop.eup %2769  ;;  %1386 = vmax.xlane.f32.xlu1 %v1371_v61  ;;  %v541_v61 = vld [vmem:[%s3456_s22 + $0x1a0] sm:$0xff] }
 0x355   : > { %v1482_v63 = vmul.f32 %v2770_v62, %v1405_v40  ;;  %v1481_v0 = vmul.f32 %v2770_v62, %v1404_v39  ;;  %v556_v39 = vld [vmem:[%s3456_s22 + $0x218] sm:$0xff] }
 0x356   : > { %v540_v62 = vld [vmem:[%s3456_s22 + $0x198] sm:$0xff] }
 0x357   : > { %1557 = vmatmul.mubr.f32.vlgmr.msra.gmra.mxu0 %v1481_v0  ;;  %2589 = vmatprep.mubr.f32.mxu1 %v1481_v0  ;;  %v539_v0 = vld [vmem:[%s3456_s22 + $0x190] sm:$0xff] }
 0x358   : > { %2590 = vmatmul.mubr.f32.vlgmr.msra.gmra.mxu1 %v1482_v63  ;;  %1562 = vmatprep.mubr.f32.mxu0 %v2942_v28 }
 0x359   : > { %1645 = vmatpush1.msra.mxu0 %v582_v1  ;;  %2593 = vmatpush3.msra.mxu1 %v584_v30  ;;  %v537_v1 = vld [vmem:[%s3456_s22 + $0x180] sm:$0xff] }
 0x35a   : > { %1646 = vmatprep.subr.mxu0 %v580_v2  ;;  %2594 = vmatprep.subr.mxu1 %v581_v3  ;;  %v631_v2 = vld [vmem:[%s3456_s22 + $0x470] sm:$0xff] }
 0x35b   : > { %v1377_v7 = vpop.xlane.xlu0 %1376  ;;  %1563 = vmatmul.mubr.f32.gmra.mxu0 %v1482_v63  ;;  %2595 = vmatpush3.msra.mxu1 %v581_v3  ;;  %v538_v63 = vld [vmem:[%s3456_s22 + $0x188] sm:$0xff]  ;;  %v632_v3 = vld [vmem:[%s3456_s22 + $0x478] sm:$0xff] }
 0x35c   : > { %vm1390_vm1 = vcmp.ge.f32.partialorder %v3404_v44, %v1377_v7  ;;  %1647 = vmatpush1.msra.mxu0 %v579_v4  ;;  %2596 = vmatprep.subr.mxu1 %v578_v5 }
 0x35d   : > { %vm1398_vm2 = vmand %vm1390_vm1, %vm1283_vm0  ;;  %1648 = vmatprep.subr.mxu0 %v577_v6  ;;  %2597 = vmatpush3.msra.mxu1 %v578_v5 }
 0x35e   : > { %1649 = vmatpush1.msra.mxu0 %v576_v9  ;;  %2598 = vmatprep.subr.mxu1 %v575_v10  ;;  %v3552_v19 = vsel %vm1398_vm2, %v3404_v44, 0.0  ;;  %v565_v44 = vld [vmem:[%s3456_s22 + $0x260] sm:$0xff] }
 0x35f   : > { %v1379_v16 = vpop.xlane.xlu1 %1378  ;;  %1650 = vmatprep.subr.mxu0 %v574_v12  ;;  %2599 = vmatpush3.msra.mxu1 %v575_v10  ;;  %v1414_v25 = vmul.f32 %v3552_v19, %v3552_v19 }
 0x360   : > { %vm1391_vm3 = vcmp.ge.f32.partialorder %v3409_v47, %v1379_v16  ;;  %1651 = vmatpush1.msra.mxu0 %v573_v13  ;;  %2600 = vmatprep.subr.mxu1 %v572_v14  ;;  %v628_v16 = vld [vmem:[%s3456_s22 + $0x458] sm:$0xff] }
 0x361   : > { %vm1399_vm4 = vmand %vm1391_vm3, %vm1283_vm0  ;;  %1652 = vmatprep.subr.mxu0 %v571_v15  ;;  %2601 = vmatpush3.msra.mxu1 %v572_v14  ;;  %v630_v15 = vld [vmem:[%s3456_s22 + $0x468] sm:$0xff] }
 0x362   : > { %v3561_v24 = vsel %vm1399_vm4, %v3409_v47, 0.0  ;;  %1653 = vmatpush1.msra.mxu0 %v570_v17  ;;  %2602 = vmatprep.subr.mxu1 %v569_v18  ;;  %v562_v47 = vld [vmem:[%s3456_s22 + $0x248] sm:$0xff]  ;;  %v629_v17 = vld [vmem:[%s3456_s22 + $0x460] sm:$0xff] }
 0x363   : > { %v1415_v26 = vmul.f32 %v3561_v24, %v3561_v24  ;;  %1654 = vmatprep.subr.mxu0 %v568_v20  ;;  %2603 = vmatpush3.msra.mxu1 %v569_v18  ;;  %v627_v18 = vld [vmem:[%s3456_s22 + $0x450] sm:$0xff]  ;;  %v626_v20 = vld [vmem:[%s3456_s22 + $0x448] sm:$0xff] }
 0x364   : > { %1655 = vmatpush1.msra.mxu0 %v567_v21  ;;  %2604 = vmatprep.subr.mxu1 %v566_v22 }
 0x365   : > { %v1427_v30 = vadd.f32 %v1415_v26, %v1414_v25  ;;  %1656 = vmatprep.subr.mxu0 %v565_v44  ;;  %2605 = vmatpush3.msra.mxu1 %v566_v22  ;;  %v624_v22 = vld [vmem:[%s3456_s22 + $0x438] sm:$0xff]  ;;  %v622_v44 = vld [vmem:[%s3456_s22 + $0x428] sm:$0xff]  ;;  %v621_v26 = vld [vmem:[%s3456_s22 + $0x420] sm:$0xff] }
 0x366   : > { %1657 = vmatpush1.msra.mxu0 %v564_v27  ;;  %2606 = vmatprep.subr.mxu1 %v563_v29  ;;  %v620_v27 = vld [vmem:[%s3456_s22 + $0x418] sm:$0xff] }
 0x367   : > { %v1428_v36 = vrot.slane %v1427_v30, 4  ;;  %1658 = vmatprep.subr.mxu0 %v562_v47  ;;  %2607 = vmatpush3.msra.mxu1 %v563_v29  ;;  %v619_v47 = vld [vmem:[%s3456_s22 + $0x410] sm:$0xff] }
 0x368   : > { %1659 = vmatpush1.msra.mxu0 %v561_v31  ;;  %2608 = vmatprep.subr.mxu1 %v560_v33  ;;  %v617_v31 = vld [vmem:[%s3456_s22 + $0x400] sm:$0xff] }
 0x369   : > { %v1429_v40 = vadd.f32 %v1428_v36, %v1427_v30  ;;  %1660 = vmatprep.subr.mxu0 %v559_v34  ;;  %2609 = vmatpush3.msra.mxu1 %v560_v33  ;;  %v618_v30 = vld [vmem:[%s3456_s22 + $0x408] sm:$0xff] }
 0x36a   : > { %1661 = vmatpush1.msra.mxu0 %v558_v37  ;;  %2610 = vmatprep.subr.mxu1 %v557_v38  ;;  %v615_v37 = vld [vmem:[%s3456_s22 + $0x3f0] sm:$0xff] }
 0x36b   : > { %v1430_v45 = vrot.slane %v1429_v40, 2  ;;  %1662 = vmatprep.subr.mxu0 %v556_v39  ;;  %2611 = vmatpush3.msra.mxu1 %v557_v38  ;;  %v614_v38 = vld [vmem:[%s3456_s22 + $0x3e8] sm:$0xff] }
 0x36c   : > { %1663 = vmatpush1.msra.mxu0 %v555_v41  ;;  %2612 = vmatprep.subr.mxu1 %v554_v42  ;;  %v611_v41 = vld [vmem:[%s3456_s22 + $0x3d0] sm:$0xff] }
 0x36d   : > { %v1431_v50 = vadd.f32 %v1430_v45, %v1429_v40  ;;  %1664 = vmatprep.subr.mxu0 %v553_v43  ;;  %2613 = vmatpush3.msra.mxu1 %v554_v42  ;;  %v612_v40 = vld [vmem:[%s3456_s22 + $0x3d8] sm:$0xff]  ;;  %v610_v42 = vld [vmem:[%s3456_s22 + $0x3c8] sm:$0xff]  ;;  %v609_v45 = vld [vmem:[%s3456_s22 + $0x3c0] sm:$0xff] }
 0x36e   : > { %1665 = vmatpush1.msra.mxu0 %v552_v46  ;;  %2614 = vmatprep.subr.mxu1 %v551_v48  ;;  %v608_v46 = vld [vmem:[%s3456_s22 + $0x3b8] sm:$0xff] }
 0x36f   : > { %v1432_v32 = vrot.slane %v1431_v50, 1  ;;  %1666 = vmatprep.subr.mxu0 %v550_v49  ;;  %2615 = vmatpush3.msra.mxu1 %v551_v48  ;;  %v607_v48 = vld [vmem:[%s3456_s22 + $0x3b0] sm:$0xff] }
 0x370   : > { %1667 = vmatpush1.msra.mxu0 %v549_v51  ;;  %2616 = vmatprep.subr.mxu1 %v548_v52  ;;  %v605_v51 = vld [vmem:[%s3456_s22 + $0x3a0] sm:$0xff] }
 0x371   : > { %v1433_v35 = vadd.f32 %v1432_v32, %v1431_v50  ;;  %1668 = vmatprep.subr.mxu0 %v547_v53  ;;  %2617 = vmatpush3.msra.mxu1 %v548_v52  ;;  %v606_v50 = vld [vmem:[%s3456_s22 + $0x3a8] sm:$0xff]  ;;  %v604_v52 = vld [vmem:[%s3456_s22 + $0x398] sm:$0xff]  ;;  %v603_v32 = vld [vmem:[%s3456_s22 + $0x390] sm:$0xff] }
 0x372   : > { %1669 = vmatpush1.msra.mxu0 %v546_v54  ;;  %2618 = vmatprep.subr.mxu1 %v545_v55  ;;  %v602_v54 = vld [vmem:[%s3456_s22 + $0x388] sm:$0xff] }
 0x373   : > { %2771 = vrsqrt.f32 %v1433_v35  ;;  %1670 = vmatprep.subr.mxu0 %v544_v57  ;;  %2619 = vmatpush3.msra.mxu1 %v545_v55  ;;  %vm1457_vm5 = vcmp.eq.f32.partialorder %v1433_v35, inf  ;;  %v1460_v6 = vand.u32 2147483648, %v1433_v35  ;;  %vm1459_vm6 = vcmp.eq.f32.partialorder %v1433_v35, 0.0  ;;  %v601_v55 = vld [vmem:[%s3456_s22 + $0x380] sm:$0xff] }
 0x374   : > { %1671 = vmatpush1.msra.mxu0 %v543_v58  ;;  %2620 = vmatprep.subr.mxu1 %v542_v60  ;;  %v599_v58 = vld [vmem:[%s3456_s22 + $0x370] sm:$0xff] }
 0x375   : > { %1672 = vmatprep.subr.mxu0 %v541_v61  ;;  %2621 = vmatpush3.msra.mxu1 %v542_v60  ;;  %v598_v60 = vld [vmem:[%s3456_s22 + $0x368] sm:$0xff] }
 0x376   : > { %1673 = vmatpush1.msra.mxu0 %v540_v62  ;;  %1708 = vmatprep.mubr.f32.mxu0 %v2942_v28  ;;  %v597_v62 = vld [vmem:[%s3456_s22 + $0x360] sm:$0xff] }
 0x377   : > { %1674 = vmatprep.subr.mxu0 %v538_v63  ;;  %2622 = vmatprep.subr.mxu1 %v539_v0  ;;  %v596_v63 = vld [vmem:[%s3456_s22 + $0x358] sm:$0xff] }
 0x378   : > { %1675 = vmatpush1.msra.mxu0 %v537_v1  ;;  %2623 = vmatpush3.msra.mxu1 %v539_v0  ;;  %v595_v0 = vld [vmem:[%s3456_s22 + $0x350] sm:$0xff] }
 0x379   : > { %1796 = vmatprep.subr.mxu0 %v631_v2  ;;  %2627 = vmatprep.subr.mxu1 %v632_v3  ;;  %v594_v2 = vld [vmem:[%s3456_s22 + $0x348] sm:$0xff] }
 0x380   : > { %v2772_v4 = vpop.eup %2771 }
 0x381   : > { %v1456_v5 = vmul.f32 %v2772_v4, %v1433_v35  ;;  %v592_v4 = vld [vmem:[%s3456_s22 + $0x338] sm:$0xff] }
 0x383   : > { %v1458_v7 = vsel %vm1457_vm5, %v1433_v35, %v1456_v5  ;;  %v600_v35 = vld [vmem:[%s3456_s22 + $0x378] sm:$0xff]  ;;  %v591_v5 = vld [vmem:[%s3456_s22 + $0x330] sm:$0xff] }
 0x384   : > { %v1461_v9 = vsel %vm1459_vm6, %v1460_v6, %v1458_v7  ;;  %v590_v6 = vld [vmem:[%s3456_s22 + $0x328] sm:$0xff]  ;;  %v589_v7 = vld [vmem:[%s3456_s22 + $0x320] sm:$0xff] }
 0x385   : > { %v1477_v10 = vmax.f32 %v1461_v9, 1e-12  ;;  %v588_v9 = vld [vmem:[%s3456_s22 + $0x318] sm:$0xff] }
 0x387   : > { %2773 = vrcp.f32 %v1477_v10  ;;  %v586_v10 = vld [vmem:[%s3456_s22 + $0x308] sm:$0xff] }
 0x394   : > { %v2774_v12 = vpop.eup %2773 }
 0x395   : > { %v1485_v13 = vmul.f32 %v2774_v12, %v3561_v24  ;;  %v1484_v14 = vmul.f32 %v2774_v12, %v3552_v19  ;;  %v625_v19 = vld [vmem:[%s3456_s22 + $0x440] sm:$0xff]  ;;  %v623_v24 = vld [vmem:[%s3456_s22 + $0x430] sm:$0xff] }
 0x396   : > { %v587_v12 = vld [vmem:[%s3456_s22 + $0x310] sm:$0xff] }
 0x397   : > { %1709 = vmatmul.mubr.f32.vlgmr.msra.gmra.mxu0 %v1484_v14  ;;  %2624 = vmatprep.mubr.f32.mxu1 %v1484_v14  ;;  %v679_v14 = vld [vmem:[%s3456_s22 + $0x5f0] sm:$0xff] }
 0x398   : > { %2625 = vmatmul.mubr.f32.vlgmr.msra.gmra.mxu1 %v1485_v13  ;;  %1714 = vmatprep.mubr.f32.mxu0 %v2942_v28 }
 0x399   : > { %1797 = vmatpush1.msra.mxu0 %v630_v15  ;;  %2628 = vmatpush3.msra.mxu1 %v632_v3  ;;  %v593_v3 = vld [vmem:[%s3456_s22 + $0x340] sm:$0xff]  ;;  %v680_v15 = vld [vmem:[%s3456_s22 + $0x5f8] sm:$0xff] }
 0x39a   : > { %1798 = vmatprep.subr.mxu0 %v628_v16  ;;  %2629 = vmatprep.subr.mxu1 %v629_v17 }
 0x39b   : > { %v1381_v21 = vpop.xlane.xlu0 %1380  ;;  %1715 = vmatmul.mubr.f32.gmra.mxu0 %v1485_v13  ;;  %2630 = vmatpush3.msra.mxu1 %v629_v17  ;;  %v585_v13 = vld [vmem:[%s3456_s22 + $0x300] sm:$0xff] }
 0x39c   : > { %vm1392_vm7 = vcmp.ge.f32.partialorder %v3416_v56, %v1381_v21  ;;  %1799 = vmatpush1.msra.mxu0 %v627_v18  ;;  %2631 = vmatprep.subr.mxu1 %v626_v20 }
 0x39d   : > { %vm1400_vm8 = vmand %vm1392_vm7, %vm1283_vm0  ;;  %v1383_v25 = vpop.xlane.xlu1 %1382  ;;  %1800 = vmatprep.subr.mxu0 %v625_v19  ;;  %2632 = vmatpush3.msra.mxu1 %v626_v20 }
 0x39e   : > { %v3617_v29 = vsel %vm1400_vm8, %v3416_v56, 0.0  ;;  %vm1393_vm9 = vcmp.ge.f32.partialorder %v3421_v59, %v1383_v25  ;;  %1801 = vmatpush1.msra.mxu0 %v624_v22  ;;  %2633 = vmatprep.subr.mxu1 %v623_v24  ;;  %v616_v56 = vld [vmem:[%s3456_s22 + $0x3f8] sm:$0xff]  ;;  %v678_v25 = vld [vmem:[%s3456_s22 + $0x5e8] sm:$0xff] }
 0x39f   : > { %vm1401_vm10 = vmand %vm1393_vm9, %vm1283_vm0  ;;  %1802 = vmatprep.subr.mxu0 %v622_v44  ;;  %2634 = vmatpush3.msra.mxu1 %v623_v24  ;;  %v1416_v34 = vmul.f32 %v3617_v29, %v3617_v29 }
 0x3a0   : > { %v3626_v33 = vsel %vm1401_vm10, %v3421_v59, 0.0  ;;  %1803 = vmatpush1.msra.mxu0 %v621_v26  ;;  %2635 = vmatprep.subr.mxu1 %v620_v27  ;;  %v613_v59 = vld [vmem:[%s3456_s22 + $0x3e0] sm:$0xff]  ;;  %v676_v26 = vld [vmem:[%s3456_s22 + $0x5d8] sm:$0xff] }
 0x3a1   : > { %v1417_v36 = vmul.f32 %v3626_v33, %v3626_v33  ;;  %1804 = vmatprep.subr.mxu0 %v619_v47  ;;  %2636 = vmatpush3.msra.mxu1 %v620_v27  ;;  %v677_v27 = vld [vmem:[%s3456_s22 + $0x5e0] sm:$0xff]  ;;  %v675_v47 = vld [vmem:[%s3456_s22 + $0x5d0] sm:$0xff] }
 0x3a2   : > { %1805 = vmatpush1.msra.mxu0 %v618_v30  ;;  %2637 = vmatprep.subr.mxu1 %v617_v31  ;;  %v674_v30 = vld [vmem:[%s3456_s22 + $0x5c8] sm:$0xff] }
 0x3a3   : > { %v1434_v39 = vadd.f32 %v1417_v36, %v1416_v34  ;;  %1806 = vmatprep.subr.mxu0 %v616_v56  ;;  %2638 = vmatpush3.msra.mxu1 %v617_v31  ;;  %v672_v31 = vld [vmem:[%s3456_s22 + $0x5b8] sm:$0xff]  ;;  %v670_v56 = vld [vmem:[%s3456_s22 + $0x5a8] sm:$0xff]  ;;  %v669_v36 = vld [vmem:[%s3456_s22 + $0x5a0] sm:$0xff] }
 0x3a4   : > { %1807 = vmatpush1.msra.mxu0 %v615_v37  ;;  %2639 = vmatprep.subr.mxu1 %v614_v38  ;;  %v668_v37 = vld [vmem:[%s3456_s22 + $0x598] sm:$0xff] }
 0x3a5   : > { %v1435_v43 = vrot.slane %v1434_v39, 4  ;;  %1808 = vmatprep.subr.mxu0 %v613_v59  ;;  %2640 = vmatpush3.msra.mxu1 %v614_v38  ;;  %v667_v38 = vld [vmem:[%s3456_s22 + $0x590] sm:$0xff] }
 0x3a6   : > { %1809 = vmatpush1.msra.mxu0 %v612_v40  ;;  %2641 = vmatprep.subr.mxu1 %v611_v41  ;;  %v665_v40 = vld [vmem:[%s3456_s22 + $0x580] sm:$0xff] }
 0x3a7   : > { %v1436_v49 = vadd.f32 %v1435_v43, %v1434_v39  ;;  %1810 = vmatprep.subr.mxu0 %v610_v42  ;;  %2642 = vmatpush3.msra.mxu1 %v611_v41  ;;  %v666_v39 = vld [vmem:[%s3456_s22 + $0x588] sm:$0xff]  ;;  %v664_v42 = vld [vmem:[%s3456_s22 + $0x578] sm:$0xff]  ;;  %v663_v43 = vld [vmem:[%s3456_s22 + $0x570] sm:$0xff] }
 0x3a8   : > { %1811 = vmatpush1.msra.mxu0 %v609_v45  ;;  %2643 = vmatprep.subr.mxu1 %v608_v46  ;;  %v662_v45 = vld [vmem:[%s3456_s22 + $0x568] sm:$0xff] }
 0x3a9   : > { %v1437_v53 = vrot.slane %v1436_v49, 2  ;;  %1812 = vmatprep.subr.mxu0 %v607_v48  ;;  %2644 = vmatpush3.msra.mxu1 %v608_v46 }
 0x3aa   : > { %1813 = vmatpush1.msra.mxu0 %v606_v50  ;;  %2645 = vmatprep.subr.mxu1 %v605_v51  ;;  %v659_v50 = vld [vmem:[%s3456_s22 + $0x550] sm:$0xff] }
 0x3ab   : > { %v1438_v57 = vadd.f32 %v1437_v53, %v1436_v49  ;;  %1814 = vmatprep.subr.mxu0 %v604_v52  ;;  %2646 = vmatpush3.msra.mxu1 %v605_v51  ;;  %v660_v49 = vld [vmem:[%s3456_s22 + $0x558] sm:$0xff]  ;;  %v657_v52 = vld [vmem:[%s3456_s22 + $0x540] sm:$0xff] }
 0x3ac   : > { %1815 = vmatpush1.msra.mxu0 %v603_v32  ;;  %2647 = vmatprep.subr.mxu1 %v602_v54  ;;  %v656_v53 = vld [vmem:[%s3456_s22 + $0x538] sm:$0xff]  ;;  %v655_v32 = vld [vmem:[%s3456_s22 + $0x530] sm:$0xff] }
 0x3ad   : > { %v1439_v61 = vrot.slane %v1438_v57, 1  ;;  %1816 = vmatprep.subr.mxu0 %v601_v55  ;;  %2648 = vmatpush3.msra.mxu1 %v602_v54  ;;  %v654_v55 = vld [vmem:[%s3456_s22 + $0x528] sm:$0xff] }
 0x3ae   : > { %1817 = vmatpush1.msra.mxu0 %v600_v35  ;;  %2649 = vmatprep.subr.mxu1 %v599_v58  ;;  %v652_v35 = vld [vmem:[%s3456_s22 + $0x518] sm:$0xff] }
 0x3af   : > { %v1440_v1 = vadd.f32 %v1439_v61, %v1438_v57  ;;  %1818 = vmatprep.subr.mxu0 %v598_v60  ;;  %2650 = vmatpush3.msra.mxu1 %v599_v58  ;;  %v653_v57 = vld [vmem:[%s3456_s22 + $0x520] sm:$0xff]  ;;  %v651_v60 = vld [vmem:[%s3456_s22 + $0x510] sm:$0xff]  ;;  %v650_v61 = vld [vmem:[%s3456_s22 + $0x508] sm:$0xff] }
 0x3b0   : > { %1819 = vmatpush1.msra.mxu0 %v597_v62  ;;  %2651 = vmatprep.subr.mxu1 %v596_v63  ;;  %v649_v62 = vld [vmem:[%s3456_s22 + $0x500] sm:$0xff] }
 0x3b1   : > { %2775 = vrsqrt.f32 %v1440_v1  ;;  %1820 = vmatprep.subr.mxu0 %v595_v0  ;;  %2652 = vmatpush3.msra.mxu1 %v596_v63  ;;  %vm1464_vm11 = vcmp.eq.f32.partialorder %v1440_v1, inf  ;;  %v1467_v18 = vand.u32 2147483648, %v1440_v1  ;;  %vm1466_vm12 = vcmp.eq.f32.partialorder %v1440_v1, 0.0  ;;  %v648_v0 = vld [vmem:[%s3456_s22 + $0x4f8] sm:$0xff] }
 0x3b2   : > { %1821 = vmatpush1.msra.mxu0 %v594_v2  ;;  %2653 = vmatprep.subr.mxu1 %v593_v3  ;;  %v646_v2 = vld [vmem:[%s3456_s22 + $0x4e8] sm:$0xff] }
 0x3b3   : > { %1822 = vmatprep.subr.mxu0 %v592_v4  ;;  %2654 = vmatpush3.msra.mxu1 %v593_v3  ;;  %v645_v4 = vld [vmem:[%s3456_s22 + $0x4e0] sm:$0xff] }
 0x3b4   : > { %1823 = vmatpush1.msra.mxu0 %v591_v5  ;;  %2655 = vmatprep.subr.mxu1 %v590_v6  ;;  %v644_v5 = vld [vmem:[%s3456_s22 + $0x4d8] sm:$0xff] }
 0x3b5   : > { %1824 = vmatprep.subr.mxu0 %v589_v7  ;;  %2656 = vmatpush3.msra.mxu1 %v590_v6  ;;  %v643_v6 = vld [vmem:[%s3456_s22 + $0x4d0] sm:$0xff] }
 0x3b6   : > { %1825 = vmatpush1.msra.mxu0 %v588_v9  ;;  %1860 = vmatprep.mubr.f32.mxu0 %v2942_v28  ;;  %v642_v9 = vld [vmem:[%s3456_s22 + $0x4c8] sm:$0xff] }
 0x3b7   : > { %1826 = vmatprep.subr.mxu0 %v586_v10  ;;  %2657 = vmatprep.subr.mxu1 %v587_v12  ;;  %v641_v10 = vld [vmem:[%s3456_s22 + $0x4c0] sm:$0xff] }
 0x3b8   : > { %1827 = vmatpush1.msra.mxu0 %v585_v13  ;;  %2658 = vmatpush3.msra.mxu1 %v587_v12  ;;  %v640_v12 = vld [vmem:[%s3456_s22 + $0x4b8] sm:$0xff] }
 0x3b9   : > { %1948 = vmatprep.subr.mxu0 %v679_v14  ;;  %2662 = vmatprep.subr.mxu1 %v680_v15  ;;  %v639_v14 = vld [vmem:[%s3456_s22 + $0x4b0] sm:$0xff] }
 0x3be   : > { %v2776_v16 = vpop.eup %2775 }
 0x3bf   : > { %v1463_v17 = vmul.f32 %v2776_v16, %v1440_v1  ;;  %v637_v16 = vld [vmem:[%s3456_s22 + $0x4a0] sm:$0xff] }
 0x3c1   : > { %v1465_v20 = vsel %vm1464_vm11, %v1440_v1, %v1463_v17  ;;  %v647_v1 = vld [vmem:[%s3456_s22 + $0x4f0] sm:$0xff]  ;;  %v636_v17 = vld [vmem:[%s3456_s22 + $0x498] sm:$0xff] }
 0x3c2   : > { %v1468_v19 = vsel %vm1466_vm12, %v1467_v18, %v1465_v20  ;;  %v634_v18 = vld [vmem:[%s3456_s22 + $0x488] sm:$0xff]  ;;  %v635_v20 = vld [vmem:[%s3456_s22 + $0x490] sm:$0xff] }
 0x3c3   : > { %v1478_v21 = vmax.f32 %v1468_v19, 1e-12  ;;  %v633_v19 = vld [vmem:[%s3456_s22 + $0x480] sm:$0xff] }
 0x3c5   : > { %2777 = vrcp.f32 %v1478_v21 }
 0x3d2   : > { %v2778_v22 = vpop.eup %2777 }
 0x3d3   : > { %v1488_v24 = vmul.f32 %v2778_v22, %v3626_v33  ;;  %v1487_v44 = vmul.f32 %v2778_v22, %v3617_v29  ;;  %v673_v29 = vld [vmem:[%s3456_s22 + $0x5c0] sm:$0xff]  ;;  %v671_v33 = vld [vmem:[%s3456_s22 + $0x5b0] sm:$0xff] }
 0x3d5   : > { %1861 = vmatmul.mubr.f32.vlgmr.msra.gmra.mxu0 %v1487_v44  ;;  %2659 = vmatprep.mubr.f32.mxu1 %v1487_v44 }
 0x3d6   : > { %2660 = vmatmul.mubr.f32.vlgmr.msra.gmra.mxu1 %v1488_v24  ;;  %1866 = vmatprep.mubr.f32.mxu0 %v2942_v28 }
 0x3d7   : > { %1949 = vmatpush1.msra.mxu0 %v678_v25  ;;  %2663 = vmatpush3.msra.mxu1 %v680_v15  ;;  %v638_v15 = vld [vmem:[%s3456_s22 + $0x4a8] sm:$0xff] }
 0x3d8   : > { %1950 = vmatprep.subr.mxu0 %v676_v26  ;;  %2664 = vmatprep.subr.mxu1 %v677_v27 }
 0x3d9   : > { %1867 = vmatmul.mubr.f32.gmra.mxu0 %v1488_v24  ;;  %2665 = vmatpush3.msra.mxu1 %v677_v27 }
 0x3da   : > { %1951 = vmatpush1.msra.mxu0 %v675_v47  ;;  %2666 = vmatprep.subr.mxu1 %v674_v30 }
 0x3db   : > { %v1385_v34 = vpop.xlane.xlu0 %1384  ;;  %1952 = vmatprep.subr.mxu0 %v673_v29  ;;  %2667 = vmatpush3.msra.mxu1 %v674_v30 }
 0x3dc   : > { %vm1394_vm13 = vcmp.ge.f32.partialorder %v3432_v8, %v1385_v34  ;;  %1953 = vmatpush1.msra.mxu0 %v672_v31  ;;  %2668 = vmatprep.subr.mxu1 %v671_v33 }
 0x3dd   : > { %vm1402_vm14 = vmand %vm1394_vm13, %vm1283_vm0  ;;  %v1387_v59 = vpop.xlane.xlu1 %1386  ;;  %1954 = vmatprep.subr.mxu0 %v670_v56  ;;  %2669 = vmatpush3.msra.mxu1 %v671_v33 }
 0x3de   : > { %v3688_v41 = vsel %vm1402_vm14, %v3432_v8, 0.0  ;;  %vm1395_vm15 = vcmp.ge.f32.partialorder %v3437_v11, %v1387_v59  ;;  %1955 = vmatpush1.msra.mxu0 %v669_v36  ;;  %2670 = vmatprep.subr.mxu1 %v668_v37  ;;  %v661_v8 = vld [vmem:[%s3456_s22 + $0x560] sm:$0xff] }
 0x3df   : > { %vm1403_vm1 = vmand %vm1395_vm15, %vm1283_vm0  ;;  %1956 = vmatprep.subr.mxu0 %v667_v38  ;;  %2671 = vmatpush3.msra.mxu1 %v668_v37  ;;  %v1418_v48 = vmul.f32 %v3688_v41, %v3688_v41 }
 0x3e0   : > { %v3697_v46 = vsel %vm1403_vm1, %v3437_v11, 0.0  ;;  %1957 = vmatpush1.msra.mxu0 %v666_v39  ;;  %2672 = vmatprep.subr.mxu1 %v665_v40  ;;  %v658_v11 = vld [vmem:[%s3456_s22 + $0x548] sm:$0xff] }
 0x3e1   : > { %v1419_v23 = vmul.f32 %v3697_v46, %v3697_v46  ;;  %1958 = vmatprep.subr.mxu0 %v664_v42  ;;  %2673 = vmatpush3.msra.mxu1 %v665_v40 }
 0x3e2   : > { %1959 = vmatpush1.msra.mxu0 %v663_v43  ;;  %2674 = vmatprep.subr.mxu1 %v662_v45 }
 0x3e3   : > { %v1441_v51 = vadd.f32 %v1419_v23, %v1418_v48  ;;  %1960 = vmatprep.subr.mxu0 %v661_v8  ;;  %2675 = vmatpush3.msra.mxu1 %v662_v45 }
 0x3e4   : > { %1961 = vmatpush1.msra.mxu0 %v660_v49  ;;  %2676 = vmatprep.subr.mxu1 %v659_v50 }
 0x3e5   : > { %v1442_v54 = vrot.slane %v1441_v51, 4  ;;  %1962 = vmatprep.subr.mxu0 %v658_v11  ;;  %2677 = vmatpush3.msra.mxu1 %v659_v50 }
 0x3e6   : > { %1963 = vmatpush1.msra.mxu0 %v657_v52  ;;  %2678 = vmatprep.subr.mxu1 %v656_v53 }
 0x3e7   : > { %v1443_v58 = vadd.f32 %v1442_v54, %v1441_v51  ;;  %1964 = vmatprep.subr.mxu0 %v655_v32  ;;  %2679 = vmatpush3.msra.mxu1 %v656_v53 }
 0x3e8   : > { %1965 = vmatpush1.msra.mxu0 %v654_v55  ;;  %2680 = vmatprep.subr.mxu1 %v653_v57 }
 0x3e9   : > { %v1444_v63 = vrot.slane %v1443_v58, 2  ;;  %1966 = vmatprep.subr.mxu0 %v652_v35  ;;  %2681 = vmatpush3.msra.mxu1 %v653_v57 }
 0x3ea   : > { %1967 = vmatpush1.msra.mxu0 %v651_v60  ;;  %2682 = vmatprep.subr.mxu1 %v650_v61 }
 0x3eb   : > { %v1445_v3 = vadd.f32 %v1444_v63, %v1443_v58  ;;  %1968 = vmatprep.subr.mxu0 %v649_v62  ;;  %2683 = vmatpush3.msra.mxu1 %v650_v61 }
 0x3ec   : > { %1969 = vmatpush1.msra.mxu0 %v648_v0  ;;  %2684 = vmatprep.subr.mxu1 %v647_v1 }
 0x3ed   : > { %v1446_v7 = vrot.slane %v1445_v3, 1  ;;  %1970 = vmatprep.subr.mxu0 %v646_v2  ;;  %2685 = vmatpush3.msra.mxu1 %v647_v1 }
 0x3ee   : > { %1971 = vmatpush1.msra.mxu0 %v645_v4  ;;  %2686 = vmatprep.subr.mxu1 %v644_v5 }
 0x3ef   : > { %v1447_v13 = vadd.f32 %v1446_v7, %v1445_v3  ;;  %1972 = vmatprep.subr.mxu0 %v643_v6  ;;  %2687 = vmatpush3.msra.mxu1 %v644_v5 }
 0x3f0   : > { %1973 = vmatpush1.msra.mxu0 %v642_v9  ;;  %2688 = vmatprep.subr.mxu1 %v641_v10 }
 0x3f1   : > { %2779 = vrsqrt.f32 %v1447_v13  ;;  %1974 = vmatprep.subr.mxu0 %v640_v12  ;;  %2689 = vmatpush3.msra.mxu1 %v641_v10  ;;  %vm1471_vm0 = vcmp.eq.f32.partialorder %v1447_v13, inf  ;;  %v1474_v24 = vand.u32 2147483648, %v1447_v13  ;;  %vm1473_vm2 = vcmp.eq.f32.partialorder %v1447_v13, 0.0 }
 0x3f2   : > { %1975 = vmatpush1.msra.mxu0 %v639_v14  ;;  %2690 = vmatprep.subr.mxu1 %v638_v15 }
 0x3f3   : > { %1976 = vmatprep.subr.mxu0 %v637_v16  ;;  %2691 = vmatpush3.msra.mxu1 %v638_v15 }
 0x3f4   : > { %1977 = vmatpush1.msra.mxu0 %v636_v17  ;;  %2012 = vmatprep.mubr.f32.mxu0 %v2942_v28 }
 0x3f5   : > { %1978 = vmatprep.subr.mxu0 %v634_v18  ;;  %2692 = vmatprep.subr.mxu1 %v635_v20 }
 0x3f6   : > { %1979 = vmatpush1.msra.mxu0 %v633_v19  ;;  %2693 = vmatpush3.msra.mxu1 %v635_v20 }
 0x3fe   : > { %v2780_v21 = vpop.eup %2779 }
 0x3ff   : > { %v1470_v22 = vmul.f32 %v2780_v21, %v1447_v13 }
 0x401   : > { %v1472_v44 = vsel %vm1471_vm0, %v1447_v13, %v1470_v22 }
 0x402   : > { %v1475_v25 = vsel %vm1473_vm2, %v1474_v24, %v1472_v44 }
 0x403   : > { %v1479_v26 = vmax.f32 %v1475_v25, 1e-12 }
 0x405   : > { %2781 = vrcp.f32 %v1479_v26 }
 0x412   : > { %v2782_v27 = vpop.eup %2781 }
 0x413   : > { %v1491_v47 = vmul.f32 %v2782_v27, %v3697_v46  ;;  %v1490_v30 = vmul.f32 %v2782_v27, %v3688_v41 }
 0x415   : > { %2013 = vmatmul.mubr.f32.vlgmr.msra.gmra.mxu0 %v1490_v30  ;;  %2694 = vmatprep.mubr.f32.mxu1 %v1490_v30 }
 0x416   : > { %2695 = vmatmul.mubr.f32.vlgmr.msra.gmra.mxu1 %v1491_v47  ;;  %2018 = vmatprep.mubr.f32.mxu0 %v2942_v28 }
 0x417   : > { %v1558_v29 = vpop.f32.mrf.mxu0 }
 0x418   : > { %2100 = vst [vmem:[%s3738_s17] sm:$0xff] %v1558_v29  ;;  %v2591_v31 = vpop.f32.mrf.mxu1 }
 0x419   : > { %2105 = vst [vmem:[%s3738_s17 + $0x28] sm:$0xff] %v2591_v31  ;;  %v1560_v33 = vpop.f32.mrf.mxu0  ;;  %2019 = vmatmul.mubr.f32.gmra.mxu0 %v1491_v47 }
 0x41a   : > { %2101 = vst [vmem:[%s3738_s17 + $0x8] sm:$0xff] %v1560_v33  ;;  %v1635_v28 = vpop.f32.mrf.mxu1 }
 0x41b   : > { %2102 = vst [vmem:[%s3738_s17 + $0x10] sm:$0xff] %v1635_v28  ;;  %v1564_v56 = vpop.f32.mrf.mxu0 }
 0x41c   : > { %2103 = vst [vmem:[%s3738_s17 + $0x18] sm:$0xff] %v1564_v56 }
 0x41d   : > { %v1566_v34 = vpop.f32.mrf.mxu0 }
 0x41e   : > { %2104 = vst [vmem:[%s3738_s17 + $0x20] sm:$0xff] %v1566_v34 }
 0x457   : > { %v1710_v36 = vpop.f32.mrf.mxu0 }
 0x458   : > { %2106 = vst [vmem:[%s3738_s17 + $0x30] sm:$0xff] %v1710_v36  ;;  %v2626_v37 = vpop.f32.mrf.mxu1 }
 0x459   : > { %2111 = vst [vmem:[%s3738_s17 + $0x58] sm:$0xff] %v2626_v37  ;;  %v1712_v38 = vpop.f32.mrf.mxu0 }
 0x45a   : > { %2107 = vst [vmem:[%s3738_s17 + $0x38] sm:$0xff] %v1712_v38  ;;  %v1787_v59 = vpop.f32.mrf.mxu1 }
 0x45b   : > { %2108 = vst [vmem:[%s3738_s17 + $0x40] sm:$0xff] %v1787_v59  ;;  %v1716_v39 = vpop.f32.mrf.mxu0 }
 0x45c   : > { %2109 = vst [vmem:[%s3738_s17 + $0x48] sm:$0xff] %v1716_v39 }
 0x45d   : > { %v1718_v40 = vpop.f32.mrf.mxu0 }
 0x45e   : > { %2110 = vst [vmem:[%s3738_s17 + $0x50] sm:$0xff] %v1718_v40 }
 0x495   : > { %v1862_v41 = vpop.f32.mrf.mxu0 }
 0x496   : > { %2112 = vst [vmem:[%s3738_s17 + $0x60] sm:$0xff] %v1862_v41  ;;  %v2661_v42 = vpop.f32.mrf.mxu1 }
 0x497   : > { %2117 = vst [vmem:[%s3738_s17 + $0x88] sm:$0xff] %v2661_v42  ;;  %v1864_v43 = vpop.f32.mrf.mxu0 }
 0x498   : > { %2113 = vst [vmem:[%s3738_s17 + $0x68] sm:$0xff] %v1864_v43  ;;  %v1939_v45 = vpop.f32.mrf.mxu1 }
 0x499   : > { %2114 = vst [vmem:[%s3738_s17 + $0x70] sm:$0xff] %v1939_v45  ;;  %v1868_v46 = vpop.f32.mrf.mxu0 }
 0x49a   : > { %2115 = vst [vmem:[%s3738_s17 + $0x78] sm:$0xff] %v1868_v46 }
 0x49b   : > { %v1870_v8 = vpop.f32.mrf.mxu0 }
 0x49c   : > { %2116 = vst [vmem:[%s3738_s17 + $0x80] sm:$0xff] %v1870_v8 }
 0x4d5   : > { %v2014_v48 = vpop.f32.mrf.mxu0 }
 0x4d6   : > { %2118 = vst [vmem:[%s3738_s17 + $0x90] sm:$0xff] %v2014_v48  ;;  %v2696_v23 = vpop.f32.mrf.mxu1 }
 0x4d7   : > { %2123 = vst [vmem:[%s3738_s17 + $0xb8] sm:$0xff] %v2696_v23  ;;  %v2016_v49 = vpop.f32.mrf.mxu0 }
 0x4d8   : > { %2119 = vst [vmem:[%s3738_s17 + $0x98] sm:$0xff] %v2016_v49  ;;  %v2091_v50 = vpop.f32.mrf.mxu1 }
 0x4d9   : > { %2120 = vst [vmem:[%s3738_s17 + $0xa0] sm:$0xff] %v2091_v50  ;;  %v2020_v11 = vpop.f32.mrf.mxu0 }
 0x4da   : > { %2121 = vst [vmem:[%s3738_s17 + $0xa8] sm:$0xff] %v2020_v11 }
 0x4db   : > { %v2022_v51 = vpop.f32.mrf.mxu0 }
 0x4dc   : > { %2122 = vst [vmem:[%s3738_s17 + $0xb0] sm:$0xff] %v2022_v51 }
 0x4dd   : > { %2880 = shalt.err (!%p2877_p5)
}
 0x4de   : > { %s2881_s7 = scalar_lea.hbm %s3767_s30, 3072  ;;  %s2885_s28 = scalar_lea.hbm %s3817_s3, 6144 }
 0x4df   : > { %p2882_p6 = scmp.ne.s32.totalorder %s3767_s30, %s2881_s7  ;;  %p2886_p12 = scmp.lt.s32.totalorder %s3767_s30, %s3817_s3 }
 0x4e0   : > { %p2887_p4 = scmp.lt.s32.totalorder %s2885_s28, %s2881_s7 }
 0x4e1   : > { %p2883_p9 = pnand %p2882_p6, %p3838_p7 }
 0x4e2   : > { %p2888_p2 = por %p2887_p4, %p2886_p12 }
 0x4e3   : > { %p2884_p11 = pneg %p2883_p9 }
 0x4e5   : > { %p2889_p13 = pnand %p2888_p2, %p2884_p11 }
 0x4e7   : > { %2892 = shalt.err (!%p2889_p13)
}
 0x4e8   : > { %s2944_s9 = smov 384   ;;  %s2945_s10 = smov 24  }
 0x4e9   : > { %2712 = dma.vmem_to_hbm [thread:$0]  (%p3838_p7), %s3769_s4, 3072, %s3767_s30, %s2125_s16, %s2944_s9, %s2944_s9, %s2945_s10  }
 0x4ea PF: > { %s2154_s20 = sand.u32 1, %s2923_s12   ;;  %p3839_p8 = scmp.ne.s32.totalorder %s3829_s24, 0 }
 0x4eb   : > { %p3840_p10 = scmp.ge.s32.totalorder %s2935_s15, 2  ;;  %s2155_s22 = scalar_lea.sflag [#allocation4], %s2154_s20 }
 0x4ed   : > { %p2725_p0 = pnand %p3840_p10, %p3839_p8 }
 0x4ef   : > { %p2726_p1 = pneg %p2725_p0 }
 0x4f1   : > { %2918 = dma.done.wait (%p2726_p1), %s2155_s22, 3072  }
 0x4f2   : > { %2920 = vsyncadd (%p2726_p1), %s2155_s22, 4294964224  ;;  %s3841_s17 = sld [smem:[#allocation12_spill]]  ;;  %p19_p3 = scmp.ge.s32.totalorder %s2991_s18, 4  }
 0x4f3   : > { %s3842_s14 = sld [smem:[#allocation13_spill]]  ;;  %s3843_s12 = smov %s2927_s13 }
 0x4f4   : > { %s3845_s15 = smov %s2991_s18  ;;  %21 = sbr.rel (!%p19_p3) target bundleno = 9 (0x9), region = 101 }
 0x4f8   : > { %s3844_s13 = smov %s3841_s17 }
 0x4f9   :  { %2160 = vsyncpa [#allocation3], 1 }
 0x4fa   :  { %2162 = vsyncpa [#allocation3 + $0x1], 1 }
 0x4fb   :  { %2163 = vsyncpa [#allocation6], 1 }
 0x4fc   :  { %2165 = vsyncpa [#allocation6 + $0x1], 1 }
 0x4fd   :  { %2166 = vsyncpa [#allocation4], 1 }
 0x4fe   :  { %2168 = vsyncpa [#allocation4 + $0x1], 1 }

</bundles_post_ra>
